<compile_context>
chip_gen: v5e
topology: v5e:2x2
jax: 0.10.0
libtpu: 0.0.40
codegen_flags: <defaults>
</compile_context>

<pallas_src>
import functools

import jax
import jax.numpy as jnp
from jax import lax
from jax.experimental import pallas as pl
from jax.experimental.pallas import tpu as pltpu


# --------------------------------------------------------------------------- #
# Small helpers
# --------------------------------------------------------------------------- #
def _rup(n, m):
    return -(-n // m) * m


def _axis_slice(arr, axis, start, length):
    idx = [slice(None)] * arr.ndim
    idx[axis] = slice(start, start + length)
    return arr[tuple(idx)]


def _pad_value(dtype):
    if jnp.issubdtype(dtype, jnp.floating):
        return -jnp.inf
    # TODO(synk): integer MaxPool2d semantics untested on the TPU path.
    return jnp.iinfo(dtype).min


def _running_maxes(xp, ks, axis):
    """runs[k][..., a, ...] = max(xp[..., a:a+k, ...]) for every valid start a.

    Larger windows are built from smaller ones (win5 -> win9 -> win13), so the
    chain costs (k0-1) + (len(ks)-1) maxima instead of sum(k-1).
    """
    length = xp.shape[axis]
    ks = sorted(ks)
    k0 = ks[0]
    n0 = length - k0 + 1
    run = _axis_slice(xp, axis, 0, n0)
    for d in range(1, k0):
        run = jnp.maximum(run, _axis_slice(xp, axis, d, n0))
    runs = {k0: run}
    prev = k0
    for k in ks[1:]:
        nk = length - k + 1
        if k <= prev + k0:
            runs[k] = jnp.maximum(
                _axis_slice(runs[prev], axis, 0, nk),
                _axis_slice(runs[k0], axis, k - k0, nk),
            )
        else:  # fallback (not hit for [5, 9, 13]): direct running max
            rk = _axis_slice(xp, axis, 0, nk)
            for d in range(1, k):
                rk = jnp.maximum(rk, _axis_slice(xp, axis, d, nk))
            runs[k] = rk
        prev = k
    return runs


# --------------------------------------------------------------------------- #
# VMEM sizing (chip-aware)
# --------------------------------------------------------------------------- #
def _vmem_budget():
    """(tile budget, vmem_limit_bytes) derived from the chip's VMEM capacity."""
    cap = None
    try:
        cap = getattr(pltpu.get_tpu_info(), "vmem_capacity_bytes", None)
    except Exception:
        cap = None
    if not cap:
        cap = 64 * 1024 * 1024          # conservative: v7x per-TensorCore VMEM
    limit = max(32 * 1024 * 1024, min((cap * 3) // 4, 100 * 1024 * 1024))
    budget = int(limit * 0.35)          # headroom for double-buffers + spills
    return budget, int(limit)


def _pick_channel_tile(C, footprint_fn, budget_bytes, min_blocks=1):
    """Largest legal channel tile (divisor of C) whose footprint fits the budget."""
    divs = [d for d in range(1, C + 1) if C % d == 0 and (d % 8 == 0 or d == C)]
    cands = [d for d in divs if C // d >= min_blocks] or divs
    cands.sort(reverse=True)
    for d in cands:
        if footprint_fn(d) <= budget_bytes:
            return d
    return cands[-1]                    # nothing "fits": smallest legal tile


def _footprint_cl(TC, H, W, M, WPAD, P, itemsize):
    """Rough per-block VMEM bytes for the channels-last kernel (incl. temporaries)."""
    HW, Hp, Wp = H * W, H + 2 * M, W + 2 * WPAD
    blk = _rup(TC, 8) * _rup(HW, 128) * itemsize       # one (TC, HW) VMEM tile
    io = 2 * blk + 2 * (P + 1) * blk                   # double-buffered in/out blocks
    lane_c = _rup(TC, 128) * itemsize                  # channels live on lanes
    tmp = lane_c * ((1 + P) * Hp * _rup(Wp, 8)         # xp + shared W-runs
                    + 3 * Hp * _rup(W, 8)              # per-k H chain
                    + 2 * H * _rup(W, 8)               # pooled
                    + 2 * _rup(HW, 8))                 # (HW, TC) transposed forms
    return io + (3 * tmp) // 2                         # 1.5x headroom on temporaries


def _footprint_nchw(TC, H, W, M, P, itemsize):
    Hp, Wp = H + 2 * M, W + 2 * M
    plane = _rup(H, 8) * _rup(W, 128) * itemsize
    plane_p = _rup(Hp, 8) * _rup(Wp, 128) * itemsize
    return TC * (2 * plane + 2 * (P + 1) * plane + plane_p + 8 * plane_p)


# --------------------------------------------------------------------------- #
# Primary kernel: channels-last compute, lane-dense HBM blocks
# --------------------------------------------------------------------------- #
def _spp_cl_kernel(x_ref, o_ref, *, rev_sizes, H, W, M, WPAD):
    """One grid step = one (batch index, channel tile) block.

    x_ref : (1, TC, H*W)        lane-dense input block (NCHW, HW flattened)
    o_ref : (1, P+1, TC, H*W)   fused output (pools in rev_sizes order, then x)
    """
    dtype = x_ref.dtype
    pad_val = _pad_value(dtype)
    TC = x_ref.shape[1]
    HW = H * W
    P = len(rev_sizes)

    x2 = x_ref[0]                                       # (TC, HW)
    o_ref[0, P] = x2                                    # identity passthrough

    # Channels -> lanes: one 2-D transpose, then a (free when W % 8 == 0)
    # split of the flattened spatial dim back into (H, W).
    x3 = jnp.transpose(x2).reshape(H, W, TC)            # (H, W, TC)

    # -inf halo built from aligned strips only (never overwritten).
    padw = jnp.full((H, WPAD, TC), pad_val, dtype)
    xw = jnp.concatenate([padw, x3, padw], axis=1)      # (H, W + 2*WPAD, TC)
    padh = jnp.full((M, W + 2 * WPAD, TC), pad_val, dtype)
    xp = jnp.concatenate([padh, xw, padh], axis=0)      # (Hp, Wp, TC)

    ks = sorted(rev_sizes)
    # W direction (sublane axis): running maxima shared across pool sizes (6 maxes).
    runs_w = _running_maxes(xp, ks, axis=1)
    for slot, k in enumerate(rev_sizes):
        cm = _axis_slice(runs_w[k], 1, WPAD - k // 2, W)        # (Hp, W, TC)
        # H direction (major axis -> free addressing): 5 -> 9 -> 13 chain within k.
        runs_h = _running_maxes(cm, [kk for kk in ks if kk <= k], axis=0)
        pooled = _axis_slice(runs_h[k], 0, M - k // 2, H)       # (H, W, TC)
        # Back to channel-major, lane-dense (TC, HW); store and retire immediately.
        o_ref[0, slot] = jnp.transpose(pooled.reshape(HW, TC))


def _spp_channels_last(x, rev_sizes, M, budget, vlimit, min_blocks):
    N, C, H, W = x.shape
    P = len(rev_sizes)
    WPAD = _rup(M, 8)                   # 8-aligned W halo (extra -inf cols harmless)
    HW = H * W
    TC = _pick_channel_tile(
        C, lambda tc: _footprint_cl(tc, H, W, M, WPAD, P, x.dtype.itemsize),
        budget, min_blocks)
    kernel = functools.partial(_spp_cl_kernel, rev_sizes=tuple(rev_sizes),
                               H=H, W=W, M=M, WPAD=WPAD)
    out = pl.pallas_call(
        kernel,
        out_shape=jax.ShapeDtypeStruct((N, P + 1, C, HW), x.dtype),
        grid=(N, C // TC),
        in_specs=[pl.BlockSpec((1, TC, HW), lambda n, cb: (n, cb, 0))],
        out_specs=pl.BlockSpec((1, P + 1, TC, HW), lambda n, cb: (n, 0, cb, 0)),
        compiler_params=pltpu.CompilerParams(
            dimension_semantics=("parallel", "parallel"),
            vmem_limit_bytes=vlimit),
    )(x.reshape(N, C, HW))
    # (N, P+1, C, H*W) -> (N, (P+1)*C, H, W): free reshape, same layout as
    # torch.cat([pool_rev0, pool_rev1, pool_rev2, x], dim=1).
    return out.reshape(N, (P + 1) * C, H, W)


# --------------------------------------------------------------------------- #
# Fallback kernel: validated NCHW compute (tiny C / lowering safety net)
# --------------------------------------------------------------------------- #
def _spp_nchw_kernel(x_ref, o_ref, xpad_ref, *, rev_sizes, H, W, M):
    """x_ref: (1, TC, H, W); o_ref: (1, P+1, TC, H, W); xpad_ref: (TC, Hp, Wp)."""
    dtype = x_ref.dtype
    pad_val = _pad_value(dtype)
    x0 = x_ref[0]                                       # (TC, H, W)
    xpad_ref[...] = jnp.full(xpad_ref.shape, pad_val, dtype)
    xpad_ref[:, M:M + H, M:M + W] = x0
    xp = xpad_ref[...]
    ks = sorted(rev_sizes)
    runs_w = _running_maxes(xp, ks, axis=2)
    for slot, k in enumerate(rev_sizes):
        cm = _axis_slice(runs_w[k], 2, M - k // 2, W)
        runs_h = _running_maxes(cm, [kk for kk in ks if kk <= k], axis=1)
        o_ref[0, slot] = _axis_slice(runs_h[k], 1, M - k // 2, H)
    o_ref[0, len(rev_sizes)] = x0


def _spp_nchw(x, rev_sizes, M, budget, vlimit, min_blocks):
    N, C, H, W = x.shape
    P = len(rev_sizes)
    Hp, Wp = H + 2 * M, W + 2 * M
    TC = _pick_channel_tile(
        C, lambda tc: _footprint_nchw(tc, H, W, M, P, x.dtype.itemsize),
        budget, min_blocks)
    kernel = functools.partial(_spp_nchw_kernel, rev_sizes=tuple(rev_sizes),
                               H=H, W=W, M=M)
    out = pl.pallas_call(
        kernel,
        out_shape=jax.ShapeDtypeStruct((N, P + 1, C, H, W), x.dtype),
        grid=(N, C // TC),
        in_specs=[pl.BlockSpec((1, TC, H, W), lambda n, cb: (n, cb, 0, 0))],
        out_specs=pl.BlockSpec((1, P + 1, TC, H, W),
                               lambda n, cb: (n, 0, cb, 0, 0)),
        scratch_shapes=[pltpu.VMEM((TC, Hp, Wp), x.dtype)],
        compiler_params=pltpu.CompilerParams(
            dimension_semantics=("parallel", "parallel"),
            vmem_limit_bytes=vlimit),
    )(x)
    return out.reshape(N, (P + 1) * C, H, W)


# --------------------------------------------------------------------------- #
# Public entry point
# --------------------------------------------------------------------------- #
def spatial_pyramid_pooling(x, pool_sizes=(5, 9, 13)):
    """Pallas SPP: concat([maxpool_k(x) for k in reversed(pool_sizes)] + [x], dim=1)."""
    N, C, H, W = x.shape
    pool_sizes = tuple(int(k) for k in pool_sizes)
    assert all(k % 2 == 1 for k in pool_sizes), "pool sizes must be odd (pad = k//2)"
    rev_sizes = pool_sizes[::-1]          # torch iterates self.maxpools[::-1]
    M = max(pool_sizes) // 2
    budget, vlimit = _vmem_budget()
    min_blocks = 2 if N == 1 else 1       # keep both v7x TensorCores busy

    if C >= 8:                            # channels-last only pays with >=1 sublane of C
        try:
            return _spp_channels_last(x, rev_sizes, M, budget, vlimit, min_blocks)
        except Exception:                 # lowering safety net -> validated NCHW kernel
            pass
    return _spp_nchw(x, rev_sizes, M, budget, vlimit, min_blocks)


# --------------------------------------------------------------------------- #
# Pure-JAX reference (mirrors nn.MaxPool2d(k, 1, k//2) + concat semantics)
# --------------------------------------------------------------------------- #
def _reference_spp(x, pool_sizes=(5, 9, 13)):
    feats = []
    for k in tuple(pool_sizes)[::-1]:
        p = k // 2
        feats.append(
            lax.reduce_window(
                x, -jnp.inf, lax.max,
                window_dimensions=(1, 1, k, k),
                window_strides=(1, 1, 1, 1),
                padding=[(0, 0), (0, 0), (p, p), (p, p)],
            )
        )
    feats.append(x)
    return jnp.concatenate(feats, axis=1)


if __name__ == "__main__":
    key = jax.random.PRNGKey(0)

    # Shape implied by the module spec (tiny channel count -> NCHW path).
    x_small = jax.random.normal(key, (2, 4, 16, 16), dtype=jnp.float32)
    out_small = jax.block_until_ready(spatial_pyramid_pooling(x_small))
    assert out_small.shape == (2, 16, 16, 16), out_small.shape
    assert jnp.allclose(out_small, _reference_spp(x_small)), \
        "Pallas SPP (small) does not match reference"

    # Wider channel count -> exercises the channels-last fast path and the
    # >=2-programs megacore constraint (N == 1).
    x_wide = jax.random.normal(jax.random.PRNGKey(0), (1, 64, 16, 16),
                               dtype=jnp.float32)
    out_wide = jax.block_until_ready(spatial_pyramid_pooling(x_wide))
    assert out_wide.shape == (1, 256, 16, 16), out_wide.shape
    assert jnp.allclose(out_wide, _reference_spp(x_wide)), \
        "Pallas SPP (wide) does not match reference"

    print("KERNEL_OK")
</pallas_src>

<mosaic_0001>
module attributes {stable_mosaic.version = 11 : i64} {
  func.func @_spp_nchw_kernel(%arg0: i32, %arg1: i32, %arg2: memref<1x4x16x16xf32, #tpu.memory_space<vmem>>, %arg3: memref<1x4x4x16x16xf32, #tpu.memory_space<vmem>>, %arg4: memref<4x28x28xf32, #tpu.memory_space<vmem>>) attributes {dimension_semantics = [#tpu.dimension_semantics<parallel>, #tpu.dimension_semantics<parallel>], iteration_bounds = array<i64: 2, 1>, scalar_prefetch = 0 : i64, scratch_operands = 1 : i64, tpu.core_type = #tpu.core_type<tc>, window_params = [{transform_indices = @transform_0, window_bounds = array<i64: 1, 4, 16, 16>}, {transform_indices = @transform_1, window_bounds = array<i64: 1, 4, 4, 16, 16>}]} {
    %c0 = arith.constant 0 : index
    %c0_0 = arith.constant 0 : index
    %c0_1 = arith.constant 0 : index
    %c0_2 = arith.constant 0 : index
    %0 = vector.load %arg2[%c0, %c0_0, %c0_1, %c0_2] : memref<1x4x16x16xf32, #tpu.memory_space<vmem>>, vector<1x4x16x16xf32>
    %1 = vector.shape_cast %0 : vector<1x4x16x16xf32> to vector<4x16x16xf32>
    %cst = arith.constant 0xFF800000 : f32
    %2 = vector.broadcast %cst : f32 to vector<4x28x28xf32>
    %c0_3 = arith.constant 0 : index
    %c0_4 = arith.constant 0 : index
    %c0_5 = arith.constant 0 : index
    %3 = vector.load %arg4[%c0_3, %c0_4, %c0_5] : memref<4x28x28xf32, #tpu.memory_space<vmem>>, vector<4x28x28xf32>
    tpu.vector_store %arg4[%c0_3, %c0_4, %c0_5], %2 {strides = array<i32>} : memref<4x28x28xf32, #tpu.memory_space<vmem>>, vector<4x28x28xf32>,
    %c0_6 = arith.constant 0 : index
    %c6 = arith.constant 6 : index
    %c6_7 = arith.constant 6 : index
    %4 = vector.load %arg4[%c0_6, %c6, %c6_7] : memref<4x28x28xf32, #tpu.memory_space<vmem>>, vector<4x16x16xf32>
    tpu.vector_store %arg4[%c0_6, %c6, %c6_7], %1 {strides = array<i32>} : memref<4x28x28xf32, #tpu.memory_space<vmem>>, vector<4x16x16xf32>,
    %c0_8 = arith.constant 0 : index
    %c0_9 = arith.constant 0 : index
    %c0_10 = arith.constant 0 : index
    %5 = vector.load %arg4[%c0_8, %c0_9, %c0_10] : memref<4x28x28xf32, #tpu.memory_space<vmem>>, vector<4x28x28xf32>
    %6 = vector.extract_strided_slice %5 {offsets = [0, 0, 0], sizes = [4, 28, 24], strides = [1, 1, 1]} : vector<4x28x28xf32> to vector<4x28x24xf32>
    %7 = vector.extract_strided_slice %5 {offsets = [0, 0, 1], sizes = [4, 28, 24], strides = [1, 1, 1]} : vector<4x28x28xf32> to vector<4x28x24xf32>
    %8 = arith.maximumf %6, %7 : vector<4x28x24xf32>
    %9 = vector.extract_strided_slice %5 {offsets = [0, 0, 2], sizes = [4, 28, 24], strides = [1, 1, 1]} : vector<4x28x28xf32> to vector<4x28x24xf32>
    %10 = arith.maximumf %8, %9 : vector<4x28x24xf32>
    %11 = vector.extract_strided_slice %5 {offsets = [0, 0, 3], sizes = [4, 28, 24], strides = [1, 1, 1]} : vector<4x28x28xf32> to vector<4x28x24xf32>
    %12 = arith.maximumf %10, %11 : vector<4x28x24xf32>
    %13 = vector.extract_strided_slice %5 {offsets = [0, 0, 4], sizes = [4, 28, 24], strides = [1, 1, 1]} : vector<4x28x28xf32> to vector<4x28x24xf32>
    %14 = arith.maximumf %12, %13 : vector<4x28x24xf32>
    %15 = vector.extract_strided_slice %14 {offsets = [0, 0, 0], sizes = [4, 28, 20], strides = [1, 1, 1]} : vector<4x28x24xf32> to vector<4x28x20xf32>
    %16 = vector.extract_strided_slice %14 {offsets = [0, 0, 4], sizes = [4, 28, 20], strides = [1, 1, 1]} : vector<4x28x24xf32> to vector<4x28x20xf32>
    %17 = arith.maximumf %15, %16 : vector<4x28x20xf32>
    %18 = vector.extract_strided_slice %17 {offsets = [0, 0, 0], sizes = [4, 28, 16], strides = [1, 1, 1]} : vector<4x28x20xf32> to vector<4x28x16xf32>
    %19 = vector.extract_strided_slice %14 {offsets = [0, 0, 8], sizes = [4, 28, 16], strides = [1, 1, 1]} : vector<4x28x24xf32> to vector<4x28x16xf32>
    %20 = arith.maximumf %18, %19 : vector<4x28x16xf32>
    %21 = vector.extract_strided_slice %20 {offsets = [0, 0, 0], sizes = [4, 24, 16], strides = [1, 1, 1]} : vector<4x28x16xf32> to vector<4x24x16xf32>
    %22 = vector.extract_strided_slice %20 {offsets = [0, 1, 0], sizes = [4, 24, 16], strides = [1, 1, 1]} : vector<4x28x16xf32> to vector<4x24x16xf32>
    %23 = arith.maximumf %21, %22 : vector<4x24x16xf32>
    %24 = vector.extract_strided_slice %20 {offsets = [0, 2, 0], sizes = [4, 24, 16], strides = [1, 1, 1]} : vector<4x28x16xf32> to vector<4x24x16xf32>
    %25 = arith.maximumf %23, %24 : vector<4x24x16xf32>
    %26 = vector.extract_strided_slice %20 {offsets = [0, 3, 0], sizes = [4, 24, 16], strides = [1, 1, 1]} : vector<4x28x16xf32> to vector<4x24x16xf32>
    %27 = arith.maximumf %25, %26 : vector<4x24x16xf32>
    %28 = vector.extract_strided_slice %20 {offsets = [0, 4, 0], sizes = [4, 24, 16], strides = [1, 1, 1]} : vector<4x28x16xf32> to vector<4x24x16xf32>
    %29 = arith.maximumf %27, %28 : vector<4x24x16xf32>
    %30 = vector.extract_strided_slice %29 {offsets = [0, 0, 0], sizes = [4, 20, 16], strides = [1, 1, 1]} : vector<4x24x16xf32> to vector<4x20x16xf32>
    %31 = vector.extract_strided_slice %29 {offsets = [0, 4, 0], sizes = [4, 20, 16], strides = [1, 1, 1]} : vector<4x24x16xf32> to vector<4x20x16xf32>
    %32 = arith.maximumf %30, %31 : vector<4x20x16xf32>
    %33 = vector.extract_strided_slice %32 {offsets = [0, 0, 0], sizes = [4, 16, 16], strides = [1, 1, 1]} : vector<4x20x16xf32> to vector<4x16x16xf32>
    %34 = vector.extract_strided_slice %29 {offsets = [0, 8, 0], sizes = [4, 16, 16], strides = [1, 1, 1]} : vector<4x24x16xf32> to vector<4x16x16xf32>
    %35 = arith.maximumf %33, %34 : vector<4x16x16xf32>
    %c0_11 = arith.constant 0 : index
    %c0_12 = arith.constant 0 : index
    %c0_13 = arith.constant 0 : index
    %c0_14 = arith.constant 0 : index
    %c0_15 = arith.constant 0 : index
    %36 = vector.load %arg3[%c0_11, %c0_12, %c0_13, %c0_14, %c0_15] : memref<1x4x4x16x16xf32, #tpu.memory_space<vmem>>, vector<1x1x4x16x16xf32>
    %37 = vector.shape_cast %36 : vector<1x1x4x16x16xf32> to vector<4x16x16xf32>
    %38 = vector.shape_cast %35 : vector<4x16x16xf32> to vector<1x1x4x16x16xf32>
    tpu.vector_store %arg3[%c0_11, %c0_12, %c0_13, %c0_14, %c0_15], %38 {strides = array<i32>} : memref<1x4x4x16x16xf32, #tpu.memory_space<vmem>>, vector<1x1x4x16x16xf32>,
    %39 = vector.extract_strided_slice %17 {offsets = [0, 0, 2], sizes = [4, 28, 16], strides = [1, 1, 1]} : vector<4x28x20xf32> to vector<4x28x16xf32>
    %40 = vector.extract_strided_slice %39 {offsets = [0, 0, 0], sizes = [4, 24, 16], strides = [1, 1, 1]} : vector<4x28x16xf32> to vector<4x24x16xf32>
    %41 = vector.extract_strided_slice %39 {offsets = [0, 1, 0], sizes = [4, 24, 16], strides = [1, 1, 1]} : vector<4x28x16xf32> to vector<4x24x16xf32>
    %42 = arith.maximumf %40, %41 : vector<4x24x16xf32>
    %43 = vector.extract_strided_slice %39 {offsets = [0, 2, 0], sizes = [4, 24, 16], strides = [1, 1, 1]} : vector<4x28x16xf32> to vector<4x24x16xf32>
    %44 = arith.maximumf %42, %43 : vector<4x24x16xf32>
    %45 = vector.extract_strided_slice %39 {offsets = [0, 3, 0], sizes = [4, 24, 16], strides = [1, 1, 1]} : vector<4x28x16xf32> to vector<4x24x16xf32>
    %46 = arith.maximumf %44, %45 : vector<4x24x16xf32>
    %47 = vector.extract_strided_slice %39 {offsets = [0, 4, 0], sizes = [4, 24, 16], strides = [1, 1, 1]} : vector<4x28x16xf32> to vector<4x24x16xf32>
    %48 = arith.maximumf %46, %47 : vector<4x24x16xf32>
    %49 = vector.extract_strided_slice %48 {offsets = [0, 0, 0], sizes = [4, 20, 16], strides = [1, 1, 1]} : vector<4x24x16xf32> to vector<4x20x16xf32>
    %50 = vector.extract_strided_slice %48 {offsets = [0, 4, 0], sizes = [4, 20, 16], strides = [1, 1, 1]} : vector<4x24x16xf32> to vector<4x20x16xf32>
    %51 = arith.maximumf %49, %50 : vector<4x20x16xf32>
    %52 = vector.extract_strided_slice %51 {offsets = [0, 2, 0], sizes = [4, 16, 16], strides = [1, 1, 1]} : vector<4x20x16xf32> to vector<4x16x16xf32>
    %c0_16 = arith.constant 0 : index
    %c1 = arith.constant 1 : index
    %c0_17 = arith.constant 0 : index
    %c0_18 = arith.constant 0 : index
    %c0_19 = arith.constant 0 : index
    %53 = vector.load %arg3[%c0_16, %c1, %c0_17, %c0_18, %c0_19] : memref<1x4x4x16x16xf32, #tpu.memory_space<vmem>>, vector<1x1x4x16x16xf32>
    %54 = vector.shape_cast %53 : vector<1x1x4x16x16xf32> to vector<4x16x16xf32>
    %55 = vector.shape_cast %52 : vector<4x16x16xf32> to vector<1x1x4x16x16xf32>
    tpu.vector_store %arg3[%c0_16, %c1, %c0_17, %c0_18, %c0_19], %55 {strides = array<i32>} : memref<1x4x4x16x16xf32, #tpu.memory_space<vmem>>, vector<1x1x4x16x16xf32>,
    %56 = vector.extract_strided_slice %14 {offsets = [0, 0, 4], sizes = [4, 28, 16], strides = [1, 1, 1]} : vector<4x28x24xf32> to vector<4x28x16xf32>
    %57 = vector.extract_strided_slice %56 {offsets = [0, 0, 0], sizes = [4, 24, 16], strides = [1, 1, 1]} : vector<4x28x16xf32> to vector<4x24x16xf32>
    %58 = vector.extract_strided_slice %56 {offsets = [0, 1, 0], sizes = [4, 24, 16], strides = [1, 1, 1]} : vector<4x28x16xf32> to vector<4x24x16xf32>
    %59 = arith.maximumf %57, %58 : vector<4x24x16xf32>
    %60 = vector.extract_strided_slice %56 {offsets = [0, 2, 0], sizes = [4, 24, 16], strides = [1, 1, 1]} : vector<4x28x16xf32> to vector<4x24x16xf32>
    %61 = arith.maximumf %59, %60 : vector<4x24x16xf32>
    %62 = vector.extract_strided_slice %56 {offsets = [0, 3, 0], sizes = [4, 24, 16], strides = [1, 1, 1]} : vector<4x28x16xf32> to vector<4x24x16xf32>
    %63 = arith.maximumf %61, %62 : vector<4x24x16xf32>
    %64 = vector.extract_strided_slice %56 {offsets = [0, 4, 0], sizes = [4, 24, 16], strides = [1, 1, 1]} : vector<4x28x16xf32> to vector<4x24x16xf32>
    %65 = arith.maximumf %63, %64 : vector<4x24x16xf32>
    %66 = vector.extract_strided_slice %65 {offsets = [0, 4, 0], sizes = [4, 16, 16], strides = [1, 1, 1]} : vector<4x24x16xf32> to vector<4x16x16xf32>
    %c0_20 = arith.constant 0 : index
    %c2 = arith.constant 2 : index
    %c0_21 = arith.constant 0 : index
    %c0_22 = arith.constant 0 : index
    %c0_23 = arith.constant 0 : index
    %67 = vector.load %arg3[%c0_20, %c2, %c0_21, %c0_22, %c0_23] : memref<1x4x4x16x16xf32, #tpu.memory_space<vmem>>, vector<1x1x4x16x16xf32>
    %68 = vector.shape_cast %67 : vector<1x1x4x16x16xf32> to vector<4x16x16xf32>
    %69 = vector.shape_cast %66 : vector<4x16x16xf32> to vector<1x1x4x16x16xf32>
    tpu.vector_store %arg3[%c0_20, %c2, %c0_21, %c0_22, %c0_23], %69 {strides = array<i32>} : memref<1x4x4x16x16xf32, #tpu.memory_space<vmem>>, vector<1x1x4x16x16xf32>,
    %c0_24 = arith.constant 0 : index
    %c3 = arith.constant 3 : index
    %c0_25 = arith.constant 0 : index
    %c0_26 = arith.constant 0 : index
    %c0_27 = arith.constant 0 : index
    %70 = vector.load %arg3[%c0_24, %c3, %c0_25, %c0_26, %c0_27] : memref<1x4x4x16x16xf32, #tpu.memory_space<vmem>>, vector<1x1x4x16x16xf32>
    %71 = vector.shape_cast %70 : vector<1x1x4x16x16xf32> to vector<4x16x16xf32>
    %72 = vector.shape_cast %1 : vector<4x16x16xf32> to vector<1x1x4x16x16xf32>
    tpu.vector_store %arg3[%c0_24, %c3, %c0_25, %c0_26, %c0_27], %72 {strides = array<i32>} : memref<1x4x4x16x16xf32, #tpu.memory_space<vmem>>, vector<1x1x4x16x16xf32>,
    return
  }
  func.func @transform_0(%arg0: i32, %arg1: i32) -> (i32, i32, i32, i32) {
    %c0_i32 = arith.constant 0 : i32
    %c0_i32_0 = arith.constant 0 : i32
    %c0_i32_1 = arith.constant 0 : i32
    return %arg0, %arg1, %c0_i32, %c0_i32_0 : i32, i32, i32, i32
  }
  func.func @transform_1(%arg0: i32, %arg1: i32) -> (i32, i32, i32, i32, i32) {
    %c0_i32 = arith.constant 0 : i32
    %c0_i32_0 = arith.constant 0 : i32
    %c0_i32_1 = arith.constant 0 : i32
    %c0_i32_2 = arith.constant 0 : i32
    return %arg0, %c0_i32, %arg1, %c0_i32_0, %c0_i32_1 : i32, i32, i32, i32, i32
  }
}

</mosaic_0001>

<bundles_post_ra>
// kernel: tpu_custom_call.1
= control target key start
LH: loop header
LB: loop body
LE: loop exit
PB: predicated region body
PF: predicated region fallthrough
CT: control target
= control target key end

     0   :  { %6 = vsyncpa [#allocation4], 0  ;;  %s3337_s0 = inlined_call_operand.hbm [shape: f32[2,4,16,16], index: 0, kind: input, shape index: {}]   ;;  %s3338_s1 = inlined_call_operand.hbm [shape: f32[2,4,4,16,16], index: 1, kind: output, shape index: {}]  }
   0x1   :  { %8 = vsyncpa [#allocation4 + $0x1], 0 }
   0x2   :  { %9 = vsyncpa [#allocation5], 0 }
   0x3   :  { %11 = vsyncpa [#allocation5 + $0x1], 0  ;;  %s1936_s6 = smov 0   ;;  %s1938_s7 = smov 0  }
   0x4   :  { %s1940_s8 = smov 0   ;;  %s1942_s9 = smov 0  }
   0x5   :  { %s1944_s10 = smov 0   ;;  %s1946_s11 = smov 0  }
   0x6 LB: > { %s1679_s12 = sadd.s32 4294967295, %s1913_s11   ;;  %s1680_s13 = sadd.s32 4294967294, %s1913_s11   ;;  %s1913_s11 = sphi %s1946_s11, %s17_s11   ;;  %s1909_s10 = sphi %s1944_s10, %s3367_s10   ;;  %s1905_s9 = sphi %s1942_s9, %s3366_s9   ;;  %s1901_s8 = sphi %s1940_s8, %s3365_s8   ;;  %s1897_s7 = sphi %s1938_s7, %s3364_s7   ;;  %s1893_s6 = sphi %s1936_s6, %s3363_s6  }
   0x7   : > { %s29_s14 = sadd.s32 1, %s1909_s10  ;;  %s38_s15 = sadd.s32 1, %s1901_s8 }
   0x8   : > { %p31_p0 = scmp.ge.s32.totalorder %s29_s14, 2  ;;  %p45_p1 = scmp.ne.s32.totalorder %s1901_s8, %s1897_s7 }
   0x9   : > { %p46_p2 = scmp.eq.s32.totalorder %s1913_s11, 0  ;;  %p51_p3 = scmp.ne.s32.totalorder %s1897_s7, %s1893_s6 }
   0xa   : > { %s3369_s14 = smov (%p31_p0, %s29_s14), 0  ;;  %p52_p5 = scmp.eq.s32.totalorder %s1679_s12, 0 }
   0xb   : > { %p1977_p4 = por %p46_p2, %p45_p1  ;;  %s33_s17 = ssub.s32 %s1909_s10, %s3369_s14 }
   0xc   : > { %p77_p6 = scmp.eq.s32.totalorder %s1679_s12, 1  ;;  %p36_p7 = scmp.eq.s32.totalorder %s33_s17, 0 }
   0xd   : > { %p1983_p8 = por %p52_p5, %p51_p3  ;;  %p83_p10 = scmp.eq.s32.totalorder %s1680_s13, 1 }
   0xe   : > { %p1987_p9 = por %p77_p6, %p45_p1  ;;  %p1682_p12 = scmp.ge.s32.totalorder %s1913_s11, 2 }
   0xf   : > { %s1992_s20 = scalar_select %p36_p7, %s1901_s8, %s38_s15  }
  0x10   : > { %p1994_p11 = por %p83_p10, %p51_p3  ;;  %p1740_p13 = scmp.lt.s32.totalorder %s1913_s11, 2 }
  0x11   : > { %s103_s22 = sand.u32 1, %s1901_s8   ;;  %s1726_s24 = sshll.u32 %s1909_s10, 6 }
  0x12   : > { %s1683_s23 = sshll.u32 %s103_s22, 6  ;;  %s115_s27 = scalar_lea.hbm %s3337_s0, %s1726_s24 }
  0x13   : > { %s107_s28 = scalar_lea.vmem [#allocation3], %s1683_s23  ;;  %s116_s30 = sshll.u32 %s115_s27, 4  ;;  %s117_s30 = int_to_ptr.hbm [resolvable:$true] %s116_s30 }
  0x14   : > { %s118_s29 = sshll.u32 %s107_s28, 4  ;;  %p1733_p0 = pnand %p1740_p13, %p1977_p4  ;;  %s119_s29 = int_to_ptr.vmem [resolvable:$true] %s118_s29 }
  0x15   : > { %p1686_p1 = scmp.ge.s32.totalorder %s1913_s11, 1  ;;  %s104_s2 = scalar_lea.sflag [#allocation4], %s103_s22 }
  0x16   : > { %s1915_s3 = smov 128   ;;  %s1916_s4 = smov 8  }
  0x17   : > { %1735 = dma.hbm_to_vmem [thread:$0]  (!%p1733_p0), %s117_s30, 1024, %s119_s29, %s104_s2, %s1915_s3, %s1915_s3, %s1916_s4  }
  0x18   : > { %p126_p2 = scmp.lt.s32.totalorder %s1913_s11, 3 }
  0x1a   : > { %p127_p3 = pnand %p1686_p1, %p126_p2 }
  0x1b   : > { %s2010_s5 = sand.u32 (!%p127_p3), 1, %s1897_s7  }
  0x1c   : > { %130 = sbr.rel (%p127_p3) target bundleno = 739 (0x2e3), region = 24  ;;  %s1687_s12 = sshll.u32 (!%p127_p3), %s2010_s5, 6 }
  0x1d   : > { %s133_s13 = scalar_lea.sflag (!%p127_p3), [#allocation4], %s2010_s5  ;;  %s2014_s15 = scalar_lea.vmem (!%p127_p3), [#allocation3], %s1687_s12 }
  0x21   : > { %1884 = dma.done.wait (%p1983_p8), %s133_s13, 1024  }
  0x22   : > { %1886 = vsyncadd (%p1983_p8), %s133_s13, 4294966272  ;;  %vm170_vm0 = vcmask 224256   ;;  %v1917_v0 = vmov -inf   ;;  %s1688_s16 = sshll.u32 %s2010_s5, 8  ;;  %v160_v1 = vld [vmem:[%s2014_s15 + $0x10] sm:$0xff]  ;;  %vm941_vm1 = vcmask 130048  }
  0x23   : > { %179 = vst.msk [vmem:[#allocation2 + $0x58] sm:$0xf] %vm170_vm0, %v1917_v0  ;;  %v158_v2 = vld [vmem:[%s2014_s15] sm:$0xff]  ;;  %s1918_s17 = smov 6   ;;  %s2024_s18 = scalar_lea.vmem [#allocation6], %s1688_s16  ;;  %v161_v3 = vld [vmem:[%s2014_s15 + $0x18] sm:$0xff] }
  0x24   : > { %171 = vst.msk [vmem:[#allocation2 + $0x18] sm:$0xf] %vm170_vm0, %v1917_v0  ;;  %196 = vrot.lane.b32.xlu1 %v160_v1, %s1918_s17  ;;  %192 = vrot.lane.b32.xlu0 %v158_v2, %s1918_s17  ;;  %v162_v4 = vld [vmem:[%s2014_s15 + $0x20] sm:$0xff]  ;;  %v159_v5 = vld [vmem:[%s2014_s15 + $0x8] sm:$0xff]  ;;  %vm166_vm2 = vcmask 228352   ;;  %s1919_s22 = smov 127  }
  0x25   : > { %175 = vst.msk [vmem:[#allocation2 + $0x38] sm:$0xf] %vm170_vm0, %v1917_v0  ;;  %200 = vrot.lane.b32.xlu2 %v162_v4, %s1918_s17  ;;  %v164_v6 = vld [vmem:[%s2014_s15 + $0x30] sm:$0xff]  ;;  %v165_v7 = vld [vmem:[%s2014_s15 + $0x38] sm:$0xff]  ;;  %v163_v8 = vld [vmem:[%s2014_s15 + $0x28] sm:$0xff]  ;;  %s1920_s23 = smov 126  }
  0x26   : > { %183 = vst.msk [vmem:[#allocation2 + $0x78] sm:$0xf] %vm170_vm0, %v1917_v0  ;;  %s1921_s24 = smov 125   ;;  %vm216_vm3 = vcmask 179248   ;;  %s1922_s25 = smov 124   ;;  %vm673_vm4 = vcmask 1046528  }
  0x27   : > { %1715 = vst.msk [vmem:[%s2024_s18 + $0xd0] sm:$0xff] %vm941_vm1, %v160_v1  ;;  %s1923_s26 = smov 120   ;;  %vm726_vm5 = vcmask 1045504   ;;  %vm779_vm6 = vcmask 1044480   ;;  %vm832_vm7 = vcmask 1043456   ;;  %vm1550_vm8 = vcmask 130052  }
  0x28   : > { %1713 = vst.msk [vmem:[%s2024_s18 + $0xc0] sm:$0xff] %vm941_vm1, %v158_v2  ;;  %vm1553_vm9 = vcmask 125952   ;;  %vm1279_vm10 = vcmask 130050   ;;  %vm1282_vm11 = vcmask 123904   ;;  %s1727_s27 = sshll.u32 %s1905_s9, 8  ;;  %s1589_s2 = sshll.u32 %s2024_s18, 4  ;;  %s1590_s2 = int_to_ptr.vmem [resolvable:$true] %s1589_s2 }
  0x29   : > { %1716 = vst.msk [vmem:[%s2024_s18 + $0xd8] sm:$0xff] %vm941_vm1, %v161_v3  ;;  %s1588_s30 = scalar_lea.hbm %s3338_s1, %s1727_s27  ;;  %s1574_s4 = scalar_lea.sflag [#allocation5], %s2010_s5 }
  0x2a   : > { %1714 = vst.msk [vmem:[%s2024_s18 + $0xc8] sm:$0xff] %vm941_vm1, %v159_v5  ;;  %v2071_v10 = vld [vmem:[#allocation2 + $0x58] sm:$0xf]  ;;  %s1591_s3 = sshll.u32 %s1588_s30, 4  ;;  %s1851_s16 = scalar_lea.hbm %s3338_s1, 512  ;;  %s1592_s3 = int_to_ptr.hbm [resolvable:$true] %s1591_s3 }
  0x2b   : > { %1719 = vst.msk [vmem:[%s2024_s18 + $0xf0] sm:$0xff] %vm941_vm1, %v164_v6  ;;  %v2059_v9 = vld [vmem:[#allocation2 + $0x18] sm:$0xf]  ;;  %s1845_s9 = sshra.s32 %s1592_s3, 4  ;;  %s1846_s9 = int_to_ptr.hbm [resolvable:$true] %s1845_s9 }
  0x2c   : > { %1717 = vst.msk [vmem:[%s2024_s18 + $0xe0] sm:$0xff] %vm941_vm1, %v162_v4  ;;  %198 = vrot.lane.b32.xlu1 %v161_v3, %s1918_s17  ;;  %194 = vrot.lane.b32.xlu0 %v159_v5, %s1918_s17  ;;  %v2073_v11 = vld [vmem:[#allocation2 + $0x38] sm:$0xf]  ;;  %s1847_s12 = scalar_lea.hbm %s1846_s9, 256  ;;  %p1852_p7 = scmp.lt.s32.totalorder %s1846_s9, %s3338_s1 }
  0x2d   : > { %1720 = vst.msk [vmem:[%s2024_s18 + $0xf8] sm:$0xff] %vm941_vm1, %v165_v7  ;;  %202 = vrot.lane.b32.xlu2 %v163_v8, %s1918_s17  ;;  %v2075_v12 = vld [vmem:[#allocation2 + $0x78] sm:$0xf]  ;;  %p1848_p4 = scmp.ne.s32.totalorder %s1846_s9, %s1847_s12  ;;  %p1853_p8 = scmp.lt.s32.totalorder %s1851_s16, %s1847_s12 }
  0x2e   : > { %1718 = vst.msk [vmem:[%s2024_s18 + $0xe8] sm:$0xff] %vm941_vm1, %v163_v8 }
  0x2f   : > { %172 = vst.msk [vmem:[#allocation2 + $0x20] sm:$0xff] %vm166_vm2, %v1917_v0  ;;  %p1849_p5 = pnand %p1848_p4, %p1987_p9  ;;  %p1854_p10 = por %p1853_p8, %p1852_p7 }
  0x30   : > { %173 = vst.msk [vmem:[#allocation2 + $0x28] sm:$0xff] %vm166_vm2, %v1917_v0 }
  0x31   : > { %167 = vst.msk [vmem:[#allocation2] sm:$0xff] %vm166_vm2, %v1917_v0  ;;  %p1850_p6 = pneg %p1849_p5 }
  0x32   : > { %168 = vst.msk [vmem:[#allocation2 + $0x8] sm:$0xff] %vm166_vm2, %v1917_v0 }
  0x33   : > { %169 = vst.msk [vmem:[#allocation2 + $0x10] sm:$0xff] %vm166_vm2, %v1917_v0  ;;  %p1855_p13 = pnand %p1854_p10, %p1850_p6 }
  0x34   : > { %174 = vst.msk [vmem:[#allocation2 + $0x30] sm:$0xff] %vm166_vm2, %v1917_v0  ;;  %204 = vrot.lane.b32.xlu0 %v164_v6, %s1918_s17  ;;  %206 = vrot.lane.b32.xlu1 %v165_v7, %s1918_s17 }
  0x35   : > { %176 = vst.msk [vmem:[#allocation2 + $0x40] sm:$0xff] %vm166_vm2, %v1917_v0  ;;  %263 = vrot.lane.b32.xlu2 %v2059_v9, %s1919_s22 }
  0x36   : > { %177 = vst.msk [vmem:[#allocation2 + $0x48] sm:$0xff] %vm166_vm2, %v1917_v0 }
  0x37   : > { %178 = vst.msk [vmem:[#allocation2 + $0x50] sm:$0xff] %vm166_vm2, %v1917_v0 }
  0x38   : > { %180 = vst.msk [vmem:[#allocation2 + $0x60] sm:$0xff] %vm166_vm2, %v1917_v0 }
  0x39   : > { %181 = vst.msk [vmem:[#allocation2 + $0x68] sm:$0xff] %vm166_vm2, %v1917_v0 }
  0x3a   : > { %182 = vst.msk [vmem:[#allocation2 + $0x70] sm:$0xff] %vm166_vm2, %v1917_v0 }
  0x3c   : > { %279 = vrot.lane.b32.xlu1 %v2071_v10, %s1919_s22  ;;  %271 = vrot.lane.b32.xlu0 %v2073_v11, %s1919_s22 }
  0x3d   : > { %287 = vrot.lane.b32.xlu2 %v2075_v12, %s1919_s22 }
  0x44   : > { %335 = vrot.lane.b32.xlu1 %v2073_v11, %s1920_s23  ;;  %327 = vrot.lane.b32.xlu0 %v2059_v9, %s1920_s23 }
  0x45   : > { %343 = vrot.lane.b32.xlu2 %v2071_v10, %s1920_s23 }
  0x4c   : > { %391 = vrot.lane.b32.xlu1 %v2059_v9, %s1921_s24  ;;  %351 = vrot.lane.b32.xlu0 %v2075_v12, %s1920_s23 }
  0x4d   : > { %399 = vrot.lane.b32.xlu2 %v2073_v11, %s1921_s24 }
  0x7f   : > { %v201_v13 = vpop.permute.xlu2 %200 }
  0x80   : > { %221 = vst.msk [vmem:[#allocation2 + $0x46] sm:$0xff] %vm216_vm3, %v201_v13 }
  0x87   : > { %v203_v14 = vpop.permute.xlu2 %202  ;;  %v2135_v30 = vld [vmem:[#allocation2 + $0x40] sm:$0xff] }
  0x88   : > { %222 = vst.msk [vmem:[#allocation2 + $0x4e] sm:$0xff] %vm216_vm3, %v203_v14 }
  0x8f   : > { %v2119_v25 = vld [vmem:[#allocation2 + $0x48] sm:$0xff]  ;;  %v2133_v29 = vld [vmem:[#allocation2 + $0x50] sm:$0xff]  ;;  %v264_v31 = vpop.permute.xlu2 %263 }
  0x90   : > { %v308_v43 = vmax.f32 %v2059_v9, %v264_v31 }
  0x96   : > { %v197_v15 = vpop.permute.xlu1 %196  ;;  %v193_v16 = vpop.permute.xlu0 %192 }
  0x97   : > { %219 = vst.msk [vmem:[#allocation2 + $0x26] sm:$0xff] %vm216_vm3, %v197_v15  ;;  %v288_v34 = vpop.permute.xlu2 %287 }
  0x98   : > { %217 = vst.msk [vmem:[#allocation2 + $0x6] sm:$0xff] %vm216_vm3, %v193_v16  ;;  %v320_v48 = vmax.f32 %v2075_v12, %v288_v34 }
  0x9e   : > { %v199_v17 = vpop.permute.xlu1 %198  ;;  %v195_v18 = vpop.permute.xlu0 %194  ;;  %v2123_v27 = vld [vmem:[#allocation2 + $0x20] sm:$0xff] }
  0x9f   : > { %220 = vst.msk [vmem:[#allocation2 + $0x2e] sm:$0xff] %vm216_vm3, %v199_v17  ;;  %v2100_v19 = vld [vmem:[#allocation2] sm:$0xff]  ;;  %v344_v37 = vpop.permute.xlu2 %343 }
  0xa0   : > { %218 = vst.msk [vmem:[#allocation2 + $0xe] sm:$0xff] %vm216_vm3, %v195_v18  ;;  %257 = vrot.lane.b32.xlu2 %v2100_v19, %s1919_s22 }
  0xa6   : > { %v2105_v20 = vld [vmem:[#allocation2 + $0x30] sm:$0xff]  ;;  %v205_v21 = vpop.permute.xlu0 %204  ;;  %v207_v22 = vpop.permute.xlu1 %206  ;;  %v2121_v26 = vld [vmem:[#allocation2 + $0x28] sm:$0xff] }
  0xa7   : > { %v2107_v23 = vld [vmem:[#allocation2 + $0x10] sm:$0xff]  ;;  %v2109_v24 = vld [vmem:[#allocation2 + $0x8] sm:$0xff]  ;;  %223 = vst.msk [vmem:[#allocation2 + $0x66] sm:$0xff] %vm216_vm3, %v205_v21  ;;  %v2172_v44 = vpop.permute.xlu2 %399 }
  0xa8   : > { %269 = vrot.lane.b32.xlu2 %v2105_v20, %s1919_s22  ;;  %261 = vrot.lane.b32.xlu1 %v2107_v23, %s1919_s22  ;;  %224 = vst.msk [vmem:[#allocation2 + $0x6e] sm:$0xff] %vm216_vm3, %v207_v22 }
  0xa9   : > { %259 = vrot.lane.b32.xlu0 %v2109_v24, %s1919_s22 }
  0xae   : > { %v2131_v28 = vld [vmem:[#allocation2 + $0x60] sm:$0xff]  ;;  %v280_v35 = vpop.permute.xlu1 %279  ;;  %v272_v38 = vpop.permute.xlu0 %271 }
  0xaf   : > { %v2143_v32 = vld [vmem:[#allocation2 + $0x70] sm:$0xff]  ;;  %v2145_v33 = vld [vmem:[#allocation2 + $0x68] sm:$0xff]  ;;  %v316_v36 = vmax.f32 %v2071_v10, %v280_v35  ;;  %v312_v40 = vmax.f32 %v2073_v11, %v272_v38 }
  0xb0   : > { %275 = vrot.lane.b32.xlu2 %v2119_v25, %s1919_s22  ;;  %267 = vrot.lane.b32.xlu1 %v2121_v26, %s1919_s22 }
  0xb1   : > { %265 = vrot.lane.b32.xlu0 %v2123_v27, %s1919_s22  ;;  %v2160_v39 = vmax.f32 %v316_v36, %v344_v37 }
  0xb6   : > { %v336_v41 = vpop.permute.xlu1 %335  ;;  %v328_v45 = vpop.permute.xlu0 %327 }
  0xb7   : > { %v2163_v42 = vmax.f32 %v312_v40, %v336_v41  ;;  %v2176_v47 = vmax.f32 %v308_v43, %v328_v45 }
  0xb8   : > { %273 = vrot.lane.b32.xlu1 %v2135_v30, %s1919_s22  ;;  %281 = vrot.lane.b32.xlu2 %v2131_v28, %s1919_s22 }
  0xb9   : > { %277 = vrot.lane.b32.xlu0 %v2133_v29, %s1919_s22  ;;  %v440_v46 = vmax.f32 %v2163_v42, %v2172_v44 }
  0xbe   : > { %v352_v49 = vpop.permute.xlu0 %351  ;;  %v2229_v54 = vpop.permute.xlu1 %391 }
  0xbf   : > { %v2185_v50 = vmax.f32 %v320_v48, %v352_v49 }
  0xc0   : > { %285 = vrot.lane.b32.xlu1 %v2143_v32, %s1919_s22  ;;  %325 = vrot.lane.b32.xlu2 %v2107_v23, %s1920_s23 }
  0xc1   : > { %283 = vrot.lane.b32.xlu0 %v2145_v33, %s1919_s22 }
  0xc8   : > { %323 = vrot.lane.b32.xlu1 %v2109_v24, %s1920_s23  ;;  %331 = vrot.lane.b32.xlu2 %v2121_v26, %s1920_s23 }
  0xc9   : > { %321 = vrot.lane.b32.xlu0 %v2100_v19, %s1920_s23 }
  0xd0   : > { %329 = vrot.lane.b32.xlu1 %v2123_v27, %s1920_s23  ;;  %337 = vrot.lane.b32.xlu2 %v2135_v30, %s1920_s23 }
  0xd1   : > { %333 = vrot.lane.b32.xlu0 %v2105_v20, %s1920_s23 }
  0xd8   : > { %341 = vrot.lane.b32.xlu1 %v2133_v29, %s1920_s23  ;;  %349 = vrot.lane.b32.xlu2 %v2143_v32, %s1920_s23 }
  0xd9   : > { %339 = vrot.lane.b32.xlu0 %v2119_v25, %s1920_s23 }
  0xe0   : > { %347 = vrot.lane.b32.xlu1 %v2145_v33, %s1920_s23  ;;  %387 = vrot.lane.b32.xlu2 %v2109_v24, %s1921_s24 }
  0xe1   : > { %345 = vrot.lane.b32.xlu0 %v2131_v28, %s1920_s23 }
  0xe8   : > { %385 = vrot.lane.b32.xlu1 %v2100_v19, %s1921_s24  ;;  %393 = vrot.lane.b32.xlu2 %v2123_v27, %s1921_s24 }
  0xe9   : > { %389 = vrot.lane.b32.xlu0 %v2107_v23, %s1921_s24 }
  0xf0   : > { %397 = vrot.lane.b32.xlu1 %v2105_v20, %s1921_s24  ;;  %405 = vrot.lane.b32.xlu2 %v2133_v29, %s1921_s24 }
  0xf1   : > { %395 = vrot.lane.b32.xlu0 %v2121_v26, %s1921_s24 }
  0xf8   : > { %403 = vrot.lane.b32.xlu1 %v2119_v25, %s1921_s24  ;;  %411 = vrot.lane.b32.xlu2 %v2145_v33, %s1921_s24 }
  0xf9   : > { %401 = vrot.lane.b32.xlu0 %v2135_v30, %s1921_s24 }
  0xfa   : > { %v258_v51 = vpop.permute.xlu2 %257 }
  0xfb   : > { %v305_v13 = vmax.f32 %v2100_v19, %v258_v51 }
 0x100   : > { %409 = vrot.lane.b32.xlu1 %v2131_v28, %s1921_s24  ;;  %449 = vrot.lane.b32.xlu2 %v2100_v19, %s1922_s25 }
 0x101   : > { %407 = vrot.lane.b32.xlu0 %v2071_v10, %s1921_s24 }
 0x102   : > { %v270_v52 = vpop.permute.xlu2 %269 }
 0x108   : > { %415 = vrot.lane.b32.xlu1 %v2075_v12, %s1921_s24  ;;  %455 = vrot.lane.b32.xlu2 %v2059_v9, %s1922_s25 }
 0x109   : > { %413 = vrot.lane.b32.xlu0 %v2143_v32, %s1921_s24 }
 0x10a   : > { %v276_v53 = vpop.permute.xlu2 %275 }
 0x10b   : > { %v314_v35 = vmax.f32 %v2119_v25, %v276_v53 }
 0x110   : > { %453 = vrot.lane.b32.xlu1 %v2107_v23, %s1922_s25  ;;  %461 = vrot.lane.b32.xlu2 %v2105_v20, %s1922_s25 }
 0x111   : > { %451 = vrot.lane.b32.xlu0 %v2109_v24, %s1922_s25 }
 0x112   : > { %v2231_v55 = vpop.permute.xlu2 %281 }
 0x113   : > { %v317_v43 = vmax.f32 %v2131_v28, %v2231_v55 }
 0x118   : > { %459 = vrot.lane.b32.xlu1 %v2121_v26, %s1922_s25  ;;  %467 = vrot.lane.b32.xlu2 %v2119_v25, %s1922_s25 }
 0x119   : > { %457 = vrot.lane.b32.xlu0 %v2123_v27, %s1922_s25 }
 0x11a   : > { %v262_v56 = vpop.permute.xlu1 %261  ;;  %v326_v57 = vpop.permute.xlu2 %325 }
 0x11b   : > { %v307_v58 = vmax.f32 %v2107_v23, %v262_v56  ;;  %v260_v59 = vpop.permute.xlu0 %259  ;;  %v311_v23 = vmax.f32 %v2105_v20, %v270_v52 }
 0x11d   : > { %v2240_v60 = vmax.f32 %v307_v58, %v326_v57 }
 0x120   : > { %465 = vrot.lane.b32.xlu1 %v2135_v30, %s1922_s25  ;;  %473 = vrot.lane.b32.xlu2 %v2131_v28, %s1922_s25 }
 0x121   : > { %463 = vrot.lane.b32.xlu0 %v2073_v11, %s1922_s25 }
 0x122   : > { %v268_v61 = vpop.permute.xlu1 %267  ;;  %v332_v62 = vpop.permute.xlu2 %331 }
 0x123   : > { %v310_v63 = vmax.f32 %v2121_v26, %v268_v61  ;;  %v266_v0 = vpop.permute.xlu0 %265 }
 0x124   : > { %v309_v22 = vmax.f32 %v2123_v27, %v266_v0 }
 0x125   : > { %v2249_v1 = vmax.f32 %v310_v63, %v332_v62 }
 0x128   : > { %471 = vrot.lane.b32.xlu1 %v2071_v10, %s1922_s25  ;;  %479 = vrot.lane.b32.xlu2 %v2075_v12, %s1922_s25  ;;  %v306_v12 = vmax.f32 %v2109_v24, %v260_v59 }
 0x129   : > { %469 = vrot.lane.b32.xlu0 %v2133_v29, %s1922_s25 }
 0x12a   : > { %v274_v2 = vpop.permute.xlu1 %273  ;;  %v338_v3 = vpop.permute.xlu2 %337 }
 0x12b   : > { %v313_v4 = vmax.f32 %v2135_v30, %v274_v2  ;;  %v278_v5 = vpop.permute.xlu0 %277 }
 0x12c   : > { %v315_v34 = vmax.f32 %v2133_v29, %v278_v5 }
 0x12d   : > { %v2258_v6 = vmax.f32 %v313_v4, %v338_v3 }
 0x130   : > { %477 = vrot.lane.b32.xlu1 %v2143_v32, %s1922_s25 }
 0x131   : > { %475 = vrot.lane.b32.xlu0 %v2145_v33, %s1922_s25 }
 0x132   : > { %v286_v7 = vpop.permute.xlu1 %285  ;;  %v350_v8 = vpop.permute.xlu2 %349 }
 0x133   : > { %v319_v9 = vmax.f32 %v2143_v32, %v286_v7  ;;  %v284_v10 = vpop.permute.xlu0 %283 }
 0x134   : > { %v318_v41 = vmax.f32 %v2145_v33, %v284_v10  ;;  %v436_v33 = vmax.f32 %v2176_v47, %v2229_v54 }
 0x135   : > { %v2265_v11 = vmax.f32 %v319_v9, %v350_v8 }
 0x13a   : > { %v324_v14 = vpop.permute.xlu1 %323  ;;  %v2269_v15 = vpop.permute.xlu2 %387 }
 0x13b   : > { %v2271_v16 = vmax.f32 %v306_v12, %v324_v14  ;;  %v322_v17 = vpop.permute.xlu0 %321 }
 0x13c   : > { %v369_v18 = vmax.f32 %v305_v13, %v322_v17 }
 0x13d   : > { %v434_v21 = vmax.f32 %v2271_v16, %v2269_v15 }
 0x142   : > { %v330_v26 = vpop.permute.xlu1 %329  ;;  %v2277_v30 = vpop.permute.xlu2 %393 }
 0x143   : > { %v2279_v24 = vmax.f32 %v309_v22, %v330_v26  ;;  %v334_v19 = vpop.permute.xlu0 %333 }
 0x144   : > { %v375_v31 = vmax.f32 %v311_v23, %v334_v19 }
 0x145   : > { %v437_v32 = vmax.f32 %v2279_v24, %v2277_v30 }
 0x14a   : > { %v342_v36 = vpop.permute.xlu1 %341  ;;  %v2285_v37 = vpop.permute.xlu2 %405 }
 0x14b   : > { %v2287_v27 = vmax.f32 %v315_v34, %v342_v36  ;;  %v340_v20 = vpop.permute.xlu0 %339 }
 0x14c   : > { %v378_v38 = vmax.f32 %v314_v35, %v340_v20 }
 0x14d   : > { %v443_v40 = vmax.f32 %v2287_v27, %v2285_v37 }
 0x152   : > { %v348_v45 = vpop.permute.xlu1 %347  ;;  %v2294_v48 = vpop.permute.xlu2 %411 }
 0x153   : > { %v2296_v29 = vmax.f32 %v318_v41, %v348_v45  ;;  %v346_v25 = vpop.permute.xlu0 %345 }
 0x154   : > { %v381_v49 = vmax.f32 %v317_v43, %v346_v25 }
 0x155   : > { %v446_v51 = vmax.f32 %v2296_v29, %v2294_v48 }
 0x15a   : > { %v386_v52 = vpop.permute.xlu1 %385  ;;  %v450_v53 = vpop.permute.xlu2 %449 }
 0x15b   : > { %v390_v56 = vpop.permute.xlu0 %389  ;;  %v433_v13 = vmax.f32 %v369_v18, %v386_v52 }
 0x15c   : > { %v435_v57 = vmax.f32 %v2240_v60, %v390_v56 }
 0x15d   : > { %v2315_v14 = vmax.f32 %v433_v13, %v450_v53 }
 0x162   : > { %v398_v58 = vpop.permute.xlu1 %397  ;;  %v456_v28 = vpop.permute.xlu2 %455 }
 0x163   : > { %v2303_v55 = vmax.f32 %v436_v33, %v456_v28  ;;  %v396_v59 = vpop.permute.xlu0 %395  ;;  %v439_v22 = vmax.f32 %v375_v31, %v398_v58 }
 0x164   : > { %v438_v61 = vmax.f32 %v2249_v1, %v396_v59 }
 0x165   : > { %535 = vrot.lane.b32.xlu0 %v2303_v55, %s1922_s25 }
 0x16a   : > { %v404_v62 = vpop.permute.xlu1 %403  ;;  %v462_v63 = vpop.permute.xlu2 %461 }
 0x16b   : > { %v402_v0 = vpop.permute.xlu0 %401  ;;  %v2319_v23 = vmax.f32 %v439_v22, %v462_v63  ;;  %v442_v18 = vmax.f32 %v378_v38, %v404_v62 }
 0x16c   : > { %v441_v2 = vmax.f32 %v2258_v6, %v402_v0 }
 0x172   : > { %v410_v3 = vpop.permute.xlu1 %409  ;;  %v468_v60 = vpop.permute.xlu2 %467 }
 0x173   : > { %v408_v4 = vpop.permute.xlu0 %407  ;;  %v2331_v31 = vmax.f32 %v442_v18, %v468_v60  ;;  %v445_v42 = vmax.f32 %v381_v49, %v410_v3 }
 0x174   : > { %v444_v19 = vmax.f32 %v2160_v39, %v408_v4 }
 0x175   : > { %v1308_v3 = vrot.slane %v2331_v31, 1  ;;  %v1360_v13 = vrot.slane %v2331_v31, 2 }
 0x17a   : > { %v416_v5 = vpop.permute.xlu1 %415  ;;  %v474_v47 = vpop.permute.xlu2 %473 }
 0x17b   : > { %v414_v54 = vpop.permute.xlu0 %413  ;;  %v448_v8 = vmax.f32 %v2185_v50, %v416_v5  ;;  %v2341_v44 = vmax.f32 %v445_v42, %v474_v47  ;;  %v1407_v5 = vrot.slane %v2319_v23, 3 }
 0x17c   : > { %v447_v7 = vmax.f32 %v2265_v11, %v414_v54 }
 0x182   : > { %v454_v9 = vpop.permute.xlu1 %453  ;;  %v480_v1 = vpop.permute.xlu2 %479 }
 0x183   : > { %v2311_v10 = vmax.f32 %v448_v8, %v480_v1  ;;  %v452_v12 = vpop.permute.xlu0 %451 }
 0x184   : > { %v2346_v39 = vmax.f32 %v434_v21, %v452_v12  ;;  %v1459_v12 = vrot.slane %v2319_v23, 4 }
 0x185   : > { %559 = vrot.lane.b32.xlu0 %v2311_v10, %s1922_s25 }
 0x186   : > { %v1294_v27 = vrot.slane %v2346_v39, 1  ;;  %v1346_v41 = vrot.slane %v2346_v39, 2  ;;  %v1398_v25 = vrot.slane %v2346_v39, 3 }
 0x18a   : > { %v460_v6 = vpop.permute.xlu1 %459 }
 0x18b   : > { %v458_v17 = vpop.permute.xlu0 %457  ;;  %v2367_v16 = vmax.f32 %v438_v61, %v460_v6  ;;  %v1355_v61 = vrot.slane %v2319_v23, 2 }
 0x18c   : > { %v2359_v36 = vmax.f32 %v437_v32, %v458_v17 }
 0x18d   : > { %529 = vrot.lane.b32.xlu0 %v2315_v14, %s1922_s25  ;;  %v1301_v48 = vrot.slane %v2367_v16, 1  ;;  %v1353_v58 = vrot.slane %v2367_v16, 2 }
 0x18f   : > { %v1356_v0 = vsel %vm726_vm5, %v1353_v58, %v1355_v61 }
 0x192   : > { %v466_v11 = vpop.permute.xlu1 %465 }
 0x193   : > { %v464_v50 = vpop.permute.xlu0 %463  ;;  %v2380_v24 = vmax.f32 %v441_v2, %v466_v11  ;;  %v1405_v2 = vrot.slane %v2367_v16, 3  ;;  %v1293_v11 = vrot.slane %v2315_v14, 1 }
 0x194   : > { %v2324_v26 = vmax.f32 %v440_v46, %v464_v50  ;;  %v2354_v46 = vmax.f32 %v435_v57, %v454_v9  ;;  %v1450_v57 = vrot.slane %v2346_v39, 4 }
 0x195   : > { %541 = vrot.lane.b32.xlu0 %v2319_v23, %s1922_s25  ;;  %v1408_v54 = vsel %vm779_vm6, %v1405_v2, %v1407_v5  ;;  %v1295_v42 = vsel %vm673_vm4, %v1293_v11, %v1294_v27 }
 0x196   : > { %543 = vrot.lane.b32.xlu1 %v2324_v26, %s1922_s25  ;;  %v1296_v20 = vrot.slane %v2354_v46, 1  ;;  %v1348_v43 = vrot.slane %v2354_v46, 2  ;;  %v1400_v49 = vrot.slane %v2354_v46, 3  ;;  %v1452_v33 = vrot.slane %v2354_v46, 4 }
 0x197   : > { %v1357_v11 = vrot.slane %v2324_v26, 2 }
 0x198   : > { %v1349_v29 = vsel %vm726_vm5, %v1346_v41, %v1348_v43  ;;  %v1401_v56 = vsel %vm779_vm6, %v1398_v25, %v1400_v49  ;;  %v1453_v63 = vsel %vm832_vm7, %v1450_v57, %v1452_v33 }
 0x19a   : > { %v472_v34 = vpop.permute.xlu1 %471 }
 0x19b   : > { %v2333_v35 = vmax.f32 %v444_v19, %v472_v34  ;;  %v470_v15 = vpop.permute.xlu0 %469  ;;  %v1298_v19 = vrot.slane %v2303_v55, 1  ;;  %v1412_v34 = vrot.slane %v2331_v31, 3 }
 0x19c   : > { %v2372_v21 = vmax.f32 %v443_v40, %v470_v15  ;;  %v1297_v40 = vsel %vm673_vm4, %v1294_v27, %v1296_v20  ;;  %v1333_v27 = vmax.f32 %v2315_v14, %v1295_v42  ;;  %v1454_v42 = vrot.slane %v2303_v55, 4 }
 0x19d   : > { %547 = vrot.lane.b32.xlu0 %v2331_v31, %s1922_s25  ;;  %551 = vrot.lane.b32.xlu2 %v2333_v35, %s1922_s25  ;;  %v1334_v45 = vmax.f32 %v2346_v39, %v1297_v40  ;;  %v1299_v15 = vsel %vm673_vm4, %v1296_v20, %v1298_v19  ;;  %v1345_v20 = vrot.slane %v2315_v14, 2  ;;  %v1307_v19 = vrot.slane %v2380_v24, 1 }
 0x19e   : > { %599 = vrot.lane.b32.xlu1 %v2303_v55, %s1923_s26  ;;  %v1310_v62 = vrot.slane %v2372_v21, 1  ;;  %v1362_v8 = vrot.slane %v2372_v21, 2  ;;  %v1414_v22 = vrot.slane %v2372_v21, 3 }
 0x19f   : > { %v1386_v52 = vmax.f32 %v1334_v45, %v1349_v29  ;;  %v1300_v45 = vrot.slane %v2359_v36, 1  ;;  %v1464_v29 = vrot.slane %v2331_v31, 4 }
 0x1a0   : > { %v1311_v47 = vsel %vm673_vm4, %v1308_v3, %v1310_v62  ;;  %v1363_v17 = vsel %vm726_vm5, %v1360_v13, %v1362_v8 }
 0x1a1   : > { %v1438_v28 = vmax.f32 %v1386_v52, %v1401_v56  ;;  %v1340_v1 = vmax.f32 %v2331_v31, %v1311_v47  ;;  %v1335_v52 = vmax.f32 %v2354_v46, %v1299_v15  ;;  %v1305_v56 = vrot.slane %v2324_v26, 1 }
 0x1a2   : > { %v478_v37 = vpop.permute.xlu1 %477  ;;  %v1397_v47 = vrot.slane %v2315_v14, 3  ;;  %v1404_v15 = vrot.slane %v2359_v36, 3 }
 0x1a3   : > { %v476_v30 = vpop.permute.xlu0 %475  ;;  %v2395_v38 = vmax.f32 %v447_v7, %v478_v37  ;;  %v1490_v60 = vmax.f32 %v1438_v28, %v1453_v63  ;;  %v1457_v7 = vrot.slane %v2367_v16, 4  ;;  %v1392_v18 = vmax.f32 %v1340_v1, %v1363_v17 }
 0x1a4   : > { %v2385_v32 = vmax.f32 %v446_v51, %v476_v30  ;;  %v1303_v51 = vrot.slane %v2319_v23, 1  ;;  %v1415_v30 = vsel %vm779_vm6, %v1412_v34, %v1414_v22  ;;  %v1466_v37 = vrot.slane %v2372_v21, 4 }
 0x1a5   : > { %553 = vrot.lane.b32.xlu0 %v2341_v44, %s1922_s25  ;;  %607 = vrot.lane.b32.xlu2 %v2324_v26, %s1923_s26  ;;  %v1460_v6 = vsel %vm832_vm7, %v1457_v7, %v1459_v12  ;;  %v1444_v40 = vmax.f32 %v1392_v18, %v1415_v30  ;;  %v1312_v30 = vrot.slane %v2333_v35, 1 }
 0x1a6   : > { %531 = vrot.lane.b32.xlu1 %v2346_v39, %s1922_s25  ;;  %v1304_v53 = vsel %vm673_vm4, %v1301_v48, %v1303_v51  ;;  %v1467_v28 = vsel %vm832_vm7, %v1464_v29, %v1466_v37 }
 0x1a7   : > { %v1337_v59 = vmax.f32 %v2367_v16, %v1304_v53  ;;  %v1350_v53 = vrot.slane %v2303_v55, 2  ;;  %v1496_v63 = vmax.f32 %v1444_v40, %v1467_v28 }
 0x1a9   : > { %v1389_v4 = vmax.f32 %v1337_v59, %v1356_v0  ;;  %v1347_v59 = vsel %vm726_vm5, %v1345_v20, %v1346_v41  ;;  %v1402_v41 = vrot.slane %v2303_v55, 3  ;;  %v1358_v20 = vsel %vm726_vm5, %v1355_v61, %v1357_v11 }
 0x1aa   : > { %v1385_v0 = vmax.f32 %v1333_v27, %v1347_v59  ;;  %v1313_v61 = vsel %vm673_vm4, %v1310_v62, %v1312_v30  ;;  %v1461_v59 = vrot.slane %v2324_v26, 4 }
 0x1ab   : > { %v1441_v9 = vmax.f32 %v1389_v4, %v1408_v54  ;;  %v1302_v4 = vsel %vm673_vm4, %v1300_v45, %v1301_v48  ;;  %v1399_v48 = vsel %vm779_vm6, %v1397_v47, %v1398_v25  ;;  %v1403_v17 = vsel %vm779_vm6, %v1400_v49, %v1402_v41 }
 0x1ac   : > { %v1336_v1 = vmax.f32 %v2359_v36, %v1302_v4  ;;  %v1455_v45 = vsel %vm832_vm7, %v1452_v33, %v1454_v42  ;;  %v1456_v33 = vrot.slane %v2359_v36, 4  ;;  %v1341_v47 = vmax.f32 %v2372_v21, %v1313_v61 }
 0x1ad   : > { %597 = vrot.lane.b32.xlu0 %v2354_v46, %s1923_s26  ;;  %533 = vrot.lane.b32.xlu2 %v2354_v46, %s1922_s25  ;;  %v1493_v50 = vmax.f32 %v1441_v9, %v1460_v6  ;;  %v1352_v9 = vrot.slane %v2359_v36, 2  ;;  %v1437_v6 = vmax.f32 %v1385_v0, %v1399_v48 }
 0x1ae   : > { %537 = vrot.lane.b32.xlu1 %v2359_v36, %s1922_s25  ;;  %v1458_v62 = vsel %vm832_vm7, %v1456_v33, %v1457_v7  ;;  %v1416_v7 = vrot.slane %v2333_v35, 3  ;;  %v1421_v33 = vrot.slane %v2395_v38, 3 }
 0x1af   : > { %v1354_v25 = vsel %vm726_vm5, %v1352_v9, %v1353_v58  ;;  %v1409_v58 = vrot.slane %v2324_v26, 3  ;;  %v1462_v9 = vsel %vm832_vm7, %v1459_v12, %v1461_v59  ;;  %v1423_v59 = vrot.slane %v2311_v10, 3 }
 0x1b0   : > { %v1388_v40 = vmax.f32 %v1336_v1, %v1354_v25  ;;  %v1417_v42 = vsel %vm779_vm6, %v1414_v22, %v1416_v7  ;;  %v1468_v25 = vrot.slane %v2333_v35, 4 }
 0x1b1   : > { %v1410_v0 = vsel %vm779_vm6, %v1407_v5, %v1409_v58 }
 0x1b5   : > { %603 = vrot.lane.b32.xlu0 %v2367_v16, %s1923_s26  ;;  %539 = vrot.lane.b32.xlu2 %v2367_v16, %s1922_s25 }
 0x1b6   : > { %549 = vrot.lane.b32.xlu1 %v2372_v21, %s1922_s25 }
 0x1bd   : > { %609 = vrot.lane.b32.xlu0 %v2380_v24, %s1923_s26  ;;  %545 = vrot.lane.b32.xlu2 %v2380_v24, %s1922_s25 }
 0x1be   : > { %555 = vrot.lane.b32.xlu1 %v2385_v32, %s1922_s25 }
 0x1c5   : > { %615 = vrot.lane.b32.xlu0 %v2333_v35, %s1923_s26  ;;  %557 = vrot.lane.b32.xlu2 %v2395_v38, %s1922_s25 }
 0x1c6   : > { %593 = vrot.lane.b32.xlu1 %v2315_v14, %s1923_s26 }
 0x1cd   : > { %621 = vrot.lane.b32.xlu0 %v2395_v38, %s1923_s26  ;;  %595 = vrot.lane.b32.xlu2 %v2346_v39, %s1923_s26 }
 0x1ce   : > { %605 = vrot.lane.b32.xlu1 %v2319_v23, %s1923_s26 }
 0x1d5   : > { %1515 = vrot.lane.b32.xlu0 %v1490_v60, %s1922_s25  ;;  %601 = vrot.lane.b32.xlu2 %v2359_v36, %s1923_s26  ;;  %v1351_v60 = vsel %vm726_vm5, %v1348_v43, %v1350_v53  ;;  %v1306_v43 = vsel %vm673_vm4, %v1303_v51, %v1305_v56  ;;  %v1309_v56 = vsel %vm673_vm4, %v1307_v19, %v1308_v3 }
 0x1d6   : > { %611 = vrot.lane.b32.xlu1 %v2331_v31, %s1923_s26  ;;  %v1387_v54 = vmax.f32 %v1335_v52, %v1351_v60  ;;  %v1338_v51 = vmax.f32 %v2319_v23, %v1306_v43  ;;  %v1364_v60 = vrot.slane %v2333_v35, 2  ;;  %v1317_v43 = vrot.slane %v2395_v38, 1 }
 0x1d7   : > { %v536_v3 = vpop.permute.xlu0 %535 }
 0x1d8   : > { %v1439_v18 = vmax.f32 %v1387_v54, %v1403_v17  ;;  %v1390_v53 = vmax.f32 %v1338_v51, %v1358_v20  ;;  %v1411_v54 = vrot.slane %v2380_v24, 3  ;;  %v1365_v1 = vsel %vm726_vm5, %v1362_v8, %v1364_v60 }
 0x1d9   : > { %v1393_v11 = vmax.f32 %v1341_v47, %v1365_v1  ;;  %v1371_v20 = vrot.slane %v2311_v10, 2  ;;  %v1366_v60 = vrot.slane %v2341_v44, 2  ;;  %v1473_v47 = vrot.slane %v2395_v38, 4 }
 0x1da   : > { %v1491_v52 = vmax.f32 %v1439_v18, %v1455_v45  ;;  %v1442_v4 = vmax.f32 %v1390_v53, %v1410_v0  ;;  %v1413_v12 = vsel %vm779_vm6, %v1411_v54, %v1412_v34 }
 0x1db   : > { %v1445_v30 = vmax.f32 %v1393_v11, %v1417_v42 }
 0x1dc   : > { %v1494_v17 = vmax.f32 %v1442_v4, %v1462_v9  ;;  %v1424_v4 = vsel %vm779_vm6, %v1421_v33, %v1423_v59 }
 0x1dd   : > { %1521 = vrot.lane.b32.xlu0 %v1493_v50, %s1922_s25  ;;  %613 = vrot.lane.b32.xlu2 %v2372_v21, %s1923_s26  ;;  %v1449_v50 = vrot.slane %v2315_v14, 4 }
 0x1de   : > { %617 = vrot.lane.b32.xlu1 %v2341_v44, %s1923_s26 }
 0x1df   : > { %v1451_v49 = vsel %vm832_vm7, %v1449_v50, %v1450_v57  ;;  %v1406_v57 = vsel %vm779_vm6, %v1404_v15, %v1405_v2  ;;  %v1339_v2 = vmax.f32 %v2380_v24, %v1309_v56  ;;  %v1319_v50 = vrot.slane %v2311_v10, 1 }
 0x1e0   : > { %v1489_v27 = vmax.f32 %v1437_v6, %v1451_v49  ;;  %v1440_v28 = vmax.f32 %v1388_v40, %v1406_v57  ;;  %v1315_v6 = vrot.slane %v2385_v32, 1  ;;  %v1369_v49 = vrot.slane %v2395_v38, 2 }
 0x1e1   : > { %v1320_v8 = vsel %vm673_vm4, %v1317_v43, %v1319_v50  ;;  %v1367_v40 = vrot.slane %v2385_v32, 2 }
 0x1e2   : > { %v1492_v41 = vmax.f32 %v1440_v28, %v1458_v62  ;;  %v1318_v15 = vsel %vm673_vm4, %v1315_v6, %v1317_v43  ;;  %v1344_v34 = vmax.f32 %v2395_v38, %v1320_v8  ;;  %v1372_v57 = vsel %vm726_vm5, %v1369_v49, %v1371_v20 }
 0x1e3   : > { %v1343_v22 = vmax.f32 %v2385_v32, %v1318_v15  ;;  %v1419_v28 = vrot.slane %v2385_v32, 3  ;;  %v1368_v9 = vsel %vm726_vm5, %v1366_v60, %v1367_v40  ;;  %v1475_v43 = vrot.slane %v2311_v10, 4 }
 0x1e4   : > { %v1396_v61 = vmax.f32 %v1344_v34, %v1372_v57 }
 0x1e5   : > { %1527 = vrot.lane.b32.xlu0 %v1496_v63, %s1922_s25  ;;  %619 = vrot.lane.b32.xlu2 %v2385_v32, %s1923_s26  ;;  %v1359_v63 = vrot.slane %v2380_v24, 2  ;;  %v1422_v54 = vsel %vm779_vm6, %v1419_v28, %v1421_v33  ;;  %v1476_v11 = vsel %vm832_vm7, %v1473_v47, %v1475_v43 }
 0x1e6   : > { %623 = vrot.lane.b32.xlu1 %v2311_v10, %s1923_s26  ;;  %v1448_v62 = vmax.f32 %v1396_v61, %v1424_v4 }
 0x1e7   : > { %v1361_v5 = vsel %vm726_vm5, %v1359_v63, %v1360_v13  ;;  %v1463_v13 = vrot.slane %v2380_v24, 4 }
 0x1e8   : > { %v1391_v48 = vmax.f32 %v1339_v2, %v1361_v5  ;;  %v2634_v5 = vmax.f32 %v2303_v55, %v536_v3  ;;  %v2647_v50 = vmax.f32 %v1448_v62, %v1476_v11 }
 0x1e9   : > { %v1465_v45 = vsel %vm832_vm7, %v1463_v13, %v1464_v29  ;;  %v1370_v29 = vsel %vm726_vm5, %v1367_v40, %v1369_v49 }
 0x1ea   : > { %v1443_v19 = vmax.f32 %v1391_v48, %v1413_v12  ;;  %v1395_v63 = vmax.f32 %v1343_v22, %v1370_v29  ;;  %v1023_v13 = vrot.slane %v2634_v5, 2  ;;  %v1127_v15 = vrot.slane %v2634_v5, 4 }
 0x1ec   : > { %v1495_v58 = vmax.f32 %v1443_v19, %v1465_v45  ;;  %v1447_v48 = vmax.f32 %v1395_v63, %v1422_v54 }
 0x1ed   : > { %1513 = vrot.lane.b32.xlu2 %v1489_v27, %s1922_s25  ;;  %v1314_v27 = vrot.slane %v2341_v44, 1 }
 0x1ee   : > { %1517 = vrot.lane.b32.xlu1 %v1491_v52, %s1922_s25  ;;  %v1469_v52 = vsel %vm832_vm7, %v1466_v37, %v1468_v25 }
 0x1ef   : > { %v1316_v53 = vsel %vm673_vm4, %v1314_v27, %v1315_v6  ;;  %v1497_v56 = vmax.f32 %v1445_v30, %v1469_v52  ;;  %v1418_v6 = vrot.slane %v2341_v44, 3 }
 0x1f0   : > { %v1342_v37 = vmax.f32 %v2341_v44, %v1316_v53 }
 0x1f1   : > { %v2653_v3 = vsel %vm779_vm6, %v1418_v6, %v1419_v28 }
 0x1f2   : > { %v2637_v1 = vmax.f32 %v1342_v37, %v1368_v9 }
 0x1f5   : > { %1519 = vrot.lane.b32.xlu2 %v1492_v41, %s1922_s25  ;;  %v3339_v41 = vrot.slane %v2385_v32, 4 }
 0x1f6   : > { %1523 = vrot.lane.b32.xlu1 %v1494_v17, %s1922_s25 }
 0x1f7   : > { %v552_v18 = vpop.permute.xlu2 %551  ;;  %v560_v51 = vpop.permute.xlu0 %559  ;;  %v1474_v55 = vsel %vm832_vm7, %v3339_v41, %v1473_v47 }
 0x1f8   : > { %v2640_v7 = vmax.f32 %v2333_v35, %v552_v18  ;;  %v2644_v17 = vmax.f32 %v2311_v10, %v560_v51  ;;  %v971_v35 = vrot.slane %v2634_v5, 1  ;;  %v2658_v8 = vmax.f32 %v1447_v48, %v1474_v55 }
 0x1f9   : > { %v1075_v18 = vrot.slane %v2634_v5, 3 }
 0x1fa   : > { %v985_v51 = vrot.slane %v2640_v7, 1  ;;  %v1037_v30 = vrot.slane %v2640_v7, 2  ;;  %v1089_v49 = vrot.slane %v2640_v7, 3 }
 0x1fd   : > { %1525 = vrot.lane.b32.xlu2 %v1495_v58, %s1922_s25 }
 0x1fe   : > { %1529 = vrot.lane.b32.xlu1 %v1497_v56, %s1922_s25  ;;  %v1141_v56 = vrot.slane %v2640_v7, 4 }
 0x1ff   : > { %v608_v0 = vpop.permute.xlu2 %607  ;;  %v530_v2 = vpop.permute.xlu0 %529 }
 0x200   : > { %v2665_v19 = vmax.f32 %v2315_v14, %v530_v2 }
 0x202   : > { %v966_v57 = vrot.slane %v2665_v19, 1  ;;  %v1018_v33 = vrot.slane %v2665_v19, 2  ;;  %v1070_v61 = vrot.slane %v2665_v19, 3  ;;  %v1122_v28 = vrot.slane %v2665_v19, 4 }
 0x207   : > { %v534_v42 = vpop.permute.xlu2 %533  ;;  %v542_v25 = vpop.permute.xlu0 %541 }
 0x208   : > { %v2672_v40 = vmax.f32 %v2354_v46, %v534_v42  ;;  %v544_v27 = vpop.permute.xlu1 %543  ;;  %v2678_v22 = vmax.f32 %v2319_v23, %v542_v25 }
 0x209   : > { %v584_v14 = vmax.f32 %v2324_v26, %v544_v27 }
 0x20a   : > { %v969_v58 = vrot.slane %v2672_v40, 1  ;;  %v1021_v52 = vrot.slane %v2672_v40, 2  ;;  %v1073_v53 = vrot.slane %v2672_v40, 3  ;;  %v1125_v26 = vrot.slane %v2672_v40, 4 }
 0x20b   : > { %v978_v46 = vrot.slane %v584_v14, 1  ;;  %v2687_v29 = vmax.f32 %v584_v14, %v608_v0  ;;  %v1030_v59 = vrot.slane %v584_v14, 2  ;;  %v1082_v63 = vrot.slane %v584_v14, 3 }
 0x20c   : > { %v972_v23 = vsel %vm673_vm4, %v969_v58, %v971_v35  ;;  %v976_v2 = vrot.slane %v2678_v22, 1  ;;  %v1024_v60 = vsel %vm726_vm5, %v1021_v52, %v1023_v13  ;;  %v1076_v0 = vsel %vm779_vm6, %v1073_v53, %v1075_v18 }
 0x20d   : > { %v1008_v37 = vmax.f32 %v2672_v40, %v972_v23  ;;  %v1028_v4 = vrot.slane %v2678_v22, 2  ;;  %v1080_v47 = vrot.slane %v2678_v22, 3  ;;  %v1132_v48 = vrot.slane %v2678_v22, 4 }
 0x20e   : > { %v979_v43 = vsel %vm673_vm4, %v976_v2, %v978_v46  ;;  %v1134_v6 = vrot.slane %v584_v14, 4  ;;  %v1128_v13 = vsel %vm832_vm7, %v1125_v26, %v1127_v15 }
 0x20f   : > { %v540_v62 = vpop.permute.xlu2 %539  ;;  %v548_v54 = vpop.permute.xlu0 %547  ;;  %v1060_v9 = vmax.f32 %v1008_v37, %v1024_v60  ;;  %v1011_v18 = vmax.f32 %v2678_v22, %v979_v43  ;;  %v1031_v14 = vsel %vm726_vm5, %v1028_v4, %v1030_v59  ;;  %v1083_v15 = vsel %vm779_vm6, %v1080_v47, %v1082_v63 }
 0x210   : > { %v2708_v55 = vmax.f32 %v2367_v16, %v540_v62  ;;  %v600_v35 = vpop.permute.xlu1 %599  ;;  %v2723_v60 = vmax.f32 %v2331_v31, %v548_v54  ;;  %v1135_v62 = vsel %vm832_vm7, %v1132_v48, %v1134_v6 }
 0x211   : > { %v2716_v25 = vmax.f32 %v2634_v5, %v600_v35  ;;  %v1112_v27 = vmax.f32 %v1060_v9, %v1076_v0  ;;  %v1063_v46 = vmax.f32 %v1011_v18, %v1031_v14 }
 0x212   : > { %v974_v23 = vrot.slane %v2708_v55, 1  ;;  %v1026_v16 = vrot.slane %v2708_v55, 2  ;;  %v1078_v5 = vrot.slane %v2708_v55, 3  ;;  %v1130_v63 = vrot.slane %v2708_v55, 4 }
 0x213   : > { %v679_v0 = vrot.slane %v2716_v25, 1  ;;  %v2729_v9 = vmax.f32 %v1112_v27, %v1128_v13  ;;  %v1115_v59 = vmax.f32 %v1063_v46, %v1083_v15  ;;  %v732_v35 = vrot.slane %v2716_v25, 2 }
 0x214   : > { %v977_v43 = vsel %vm673_vm4, %v974_v23, %v976_v2  ;;  %v785_v31 = vrot.slane %v2716_v25, 3  ;;  %v838_v6 = vrot.slane %v2716_v25, 4  ;;  %v1029_v13 = vsel %vm726_vm5, %v1026_v16, %v1028_v4 }
 0x215   : > { %v1010_v54 = vmax.f32 %v2708_v55, %v977_v43  ;;  %v1189_v18 = vrot.slane %v2729_v9, 4  ;;  %v1167_v14 = vmax.f32 %v1115_v59, %v1135_v62  ;;  %v1081_v15 = vsel %vm779_vm6, %v1078_v5, %v1080_v47 }
 0x216   : > { %v981_v43 = vrot.slane %v2723_v60, 1  ;;  %v3341_v10 = vrot.slane %v2723_v60, 2  ;;  %v3340_v59 = vrot.slane %v2723_v60, 3  ;;  %v1133_v47 = vsel %vm832_vm7, %v1130_v63, %v1132_v48 }
 0x217   : > { %v546_v27 = vpop.permute.xlu2 %545  ;;  %v554_v46 = vpop.permute.xlu0 %553  ;;  %v1062_v2 = vmax.f32 %v1010_v54, %v1029_v13  ;;  %v1220_v62 = vmax.f32 %v2729_v9, %v1189_v18  ;;  %v1194_v4 = vrot.slane %v1167_v14, 4 }
 0x218   : > { %v2749_v12 = vmax.f32 %v2380_v24, %v546_v27  ;;  %v532_v41 = vpop.permute.xlu1 %531 }
 0x219   : > { %v2756_v54 = vmax.f32 %v2346_v39, %v532_v41  ;;  %v1114_v13 = vmax.f32 %v1062_v2, %v1081_v15  ;;  %1246 = vrot.lane.b32.xlu1 %v1220_v62, %s1920_s23  ;;  %v2772_v15 = vmax.f32 %v2341_v44, %v554_v46  ;;  %v1223_v62 = vmax.f32 %v1167_v14, %v1194_v4 }
 0x21a   : > { %v980_v24 = vrot.slane %v2749_v12, 1  ;;  %v1032_v27 = vrot.slane %v2749_v12, 2  ;;  %v1084_v20 = vrot.slane %v2749_v12, 3 }
 0x21b   : > { %v967_v39 = vrot.slane %v2756_v54, 1  ;;  %v1019_v41 = vrot.slane %v2756_v54, 2  ;;  %v1071_v2 = vrot.slane %v2756_v54, 3  ;;  %v1123_v48 = vrot.slane %v2756_v54, 4 }
 0x21c   : > { %v2774_v34 = vmax.f32 %v1114_v13, %v1133_v47  ;;  %v982_v45 = vsel %vm673_vm4, %v980_v24, %v981_v43  ;;  %v1034_v37 = vsel %vm726_vm5, %v1032_v27, %v3341_v10  ;;  %v2789_v14 = vsel %vm779_vm6, %v1084_v20, %v3340_v59 }
 0x21d   : > { %v970_v11 = vsel %vm673_vm4, %v967_v39, %v969_v58  ;;  %v1022_v13 = vsel %vm726_vm5, %v1019_v41, %v1021_v52  ;;  %v1074_v58 = vsel %vm779_vm6, %v1071_v2, %v1073_v53  ;;  %v968_v47 = vsel %vm673_vm4, %v966_v57, %v967_v39 }
 0x21e   : > { %v1007_v46 = vmax.f32 %v2756_v54, %v970_v11  ;;  %v1126_v20 = vsel %vm832_vm7, %v1123_v48, %v1125_v26  ;;  %v1006_v11 = vmax.f32 %v2665_v19, %v968_v47  ;;  %v1020_v52 = vsel %vm726_vm5, %v1018_v33, %v1019_v41 }
 0x21f   : > { %v558_v24 = vpop.permute.xlu2 %557  ;;  %v598_v27 = vpop.permute.xlu0 %597  ;;  %v1192_v42 = vrot.slane %v2774_v34, 4  ;;  %v1072_v57 = vsel %vm779_vm6, %v1070_v61, %v1071_v2  ;;  %v1012_v39 = vmax.f32 %v2749_v12, %v982_v45  ;;  %v1124_v33 = vsel %vm832_vm7, %v1122_v28, %v1123_v48 }
 0x220   : > { %v538_v59 = vpop.permute.xlu1 %537  ;;  %v643_v53 = vmax.f32 %v2672_v40, %v598_v27  ;;  %v1059_v10 = vmax.f32 %v1007_v46, %v1022_v13  ;;  %v1058_v47 = vmax.f32 %v1006_v11, %v1020_v52  ;;  %v2827_v45 = vmax.f32 %v2395_v38, %v558_v24 }
 0x221   : > { %v2815_v26 = vmax.f32 %v2359_v36, %v538_v59  ;;  %v2823_v41 = vsel %vm832_vm7, %v1192_v42, %v1194_v4  ;;  %1252 = vrot.lane.b32.xlu1 %v1223_v62, %s1920_s23  ;;  %v2835_v2 = vmax.f32 %v1012_v39, %v1034_v37  ;;  %v1136_v48 = vrot.slane %v2749_v12, 4 }
 0x222   : > { %v677_v40 = vrot.slane %v643_v53, 1  ;;  %v730_v46 = vrot.slane %v643_v53, 2  ;;  %v783_v13 = vrot.slane %v643_v53, 3  ;;  %v836_v27 = vrot.slane %v643_v53, 4 }
 0x223   : > { %v1111_v36 = vmax.f32 %v1059_v10, %v1074_v58  ;;  %v1110_v61 = vmax.f32 %v1058_v47, %v1072_v57  ;;  %v973_v59 = vrot.slane %v2815_v26, 1  ;;  %v1222_v4 = vmax.f32 %v2774_v34, %v2823_v41 }
 0x224   : > { %v680_v28 = vsel %vm673_vm4, %v677_v40, %v679_v0  ;;  %v733_v10 = vsel %vm726_vm5, %v730_v46, %v732_v35  ;;  %v786_v0 = vsel %vm779_vm6, %v783_v13, %v785_v31  ;;  %v839_v37 = vsel %vm832_vm7, %v836_v27, %v838_v6 }
 0x225   : > { %v716_v11 = vmax.f32 %v643_v53, %v680_v28  ;;  %v1163_v62 = vmax.f32 %v1111_v36, %v1126_v20  ;;  %v1162_v52 = vmax.f32 %v1110_v61, %v1124_v33  ;;  %v975_v38 = vsel %vm673_vm4, %v973_v59, %v974_v23 }
 0x226   : > { %v1025_v58 = vrot.slane %v2815_v26, 2  ;;  %v1077_v23 = vrot.slane %v2815_v26, 3  ;;  %v1009_v25 = vmax.f32 %v2815_v26, %v975_v38  ;;  %v1129_v31 = vrot.slane %v2815_v26, 4 }
 0x227   : > { %v769_v24 = vmax.f32 %v716_v11, %v733_v10  ;;  %v596_v20 = vpop.permute.xlu2 %595  ;;  %v604_v53 = vpop.permute.xlu0 %603  ;;  %v1187_v57 = vrot.slane %v1163_v62, 4  ;;  %v1186_v39 = vrot.slane %v1162_v52, 4 }
 0x228   : > { %v2853_v47 = vmax.f32 %v2756_v54, %v596_v20  ;;  %v550_v35 = vpop.permute.xlu1 %549  ;;  %v2856_v33 = vmax.f32 %v2708_v55, %v604_v53  ;;  %v1027_v9 = vsel %vm726_vm5, %v1025_v58, %v1026_v16 }
 0x229   : > { %v822_v6 = vmax.f32 %v769_v24, %v786_v0  ;;  %v2861_v36 = vmax.f32 %v2372_v21, %v550_v35  ;;  %v1190_v61 = vsel %vm832_vm7, %v1187_v57, %v1189_v18  ;;  %v1188_v21 = vsel %vm832_vm7, %v1186_v39, %v1187_v57 }
 0x22a   : > { %v675_v59 = vrot.slane %v2853_v47, 1  ;;  %v728_v28 = vrot.slane %v2853_v47, 2  ;;  %v781_v11 = vrot.slane %v2853_v47, 3  ;;  %v834_v38 = vrot.slane %v2853_v47, 4 }
 0x22b   : > { %v2872_v10 = vmax.f32 %v822_v6, %v839_v37  ;;  %v1079_v18 = vsel %vm779_vm6, %v1077_v23, %v1078_v5  ;;  %v682_v24 = vrot.slane %v2856_v33, 1  ;;  %v735_v20 = vrot.slane %v2856_v33, 2 }
 0x22c   : > { %v678_v0 = vsel %vm673_vm4, %v675_v59, %v677_v40  ;;  %v788_v37 = vrot.slane %v2856_v33, 3  ;;  %v731_v16 = vsel %vm726_vm5, %v728_v28, %v730_v46  ;;  %v784_v5 = vsel %vm779_vm6, %v781_v11, %v783_v13 }
 0x22d   : > { %v715_v53 = vmax.f32 %v2853_v47, %v678_v0  ;;  %v1219_v58 = vmax.f32 %v1163_v62, %v1190_v61  ;;  %v837_v40 = vsel %vm832_vm7, %v834_v38, %v836_v27  ;;  %v1218_v57 = vmax.f32 %v1162_v52, %v1188_v21 }
 0x22e   : > { %v1061_v39 = vmax.f32 %v1009_v25, %v1027_v9  ;;  %v983_v23 = vrot.slane %v2861_v36, 1  ;;  %v900_v35 = vrot.slane %v2872_v10, 4  ;;  %v841_v0 = vrot.slane %v2856_v33, 4 }
 0x22f   : > { %v768_v6 = vmax.f32 %v715_v53, %v731_v16  ;;  %1244 = vrot.lane.b32.xlu0 %v1219_v58, %s1920_s23  ;;  %v602_v46 = vpop.permute.xlu2 %601  ;;  %v610_v54 = vpop.permute.xlu0 %609  ;;  %v1035_v13 = vrot.slane %v2861_v36, 2  ;;  %1242 = vrot.lane.b32.xlu2 %v1218_v57, %s1920_s23  ;;  %v1131_v25 = vsel %vm832_vm7, %v1129_v31, %v1130_v63  ;;  %v1087_v16 = vrot.slane %v2861_v36, 3 }
 0x230   : > { %v645_v62 = vmax.f32 %v2815_v26, %v602_v46  ;;  %v556_v27 = vpop.permute.xlu1 %555  ;;  %v2905_v52 = vmax.f32 %v2749_v12, %v610_v54  ;;  %v986_v61 = vsel %vm673_vm4, %v983_v23, %v985_v51  ;;  %v1113_v9 = vmax.f32 %v1061_v39, %v1079_v18 }
 0x231   : > { %v821_v21 = vmax.f32 %v768_v6, %v784_v5  ;;  %v1014_v53 = vmax.f32 %v2861_v36, %v986_v61  ;;  %v2918_v55 = vmax.f32 %v2385_v32, %v556_v27  ;;  %v1038_v63 = vsel %vm726_vm5, %v1035_v13, %v1037_v30 }
 0x232   : > { %v681_v58 = vrot.slane %v645_v62, 1  ;;  %v734_v26 = vrot.slane %v645_v62, 2  ;;  %v787_v57 = vrot.slane %v645_v62, 3  ;;  %v840_v46 = vrot.slane %v645_v62, 4 }
 0x233   : > { %v2915_v54 = vmax.f32 %v821_v21, %v837_v40  ;;  %v1139_v51 = vrot.slane %v2861_v36, 4  ;;  %v688_v18 = vrot.slane %v2905_v52, 1  ;;  %v741_v5 = vrot.slane %v2905_v52, 2 }
 0x234   : > { %v683_v31 = vsel %vm673_vm4, %v681_v58, %v682_v24  ;;  %v736_v27 = vsel %vm726_vm5, %v734_v26, %v735_v20  ;;  %v1165_v30 = vmax.f32 %v1113_v9, %v1131_v25  ;;  %v789_v61 = vsel %vm779_vm6, %v787_v57, %v788_v37 }
 0x235   : > { %v898_v39 = vrot.slane %v2915_v54, 4  ;;  %v717_v6 = vmax.f32 %v645_v62, %v683_v31  ;;  %v842_v21 = vsel %vm832_vm7, %v840_v46, %v841_v0  ;;  %v1066_v58 = vmax.f32 %v1014_v53, %v1038_v63 }
 0x236   : > { %v984_v40 = vsel %vm673_vm4, %v981_v43, %v983_v23  ;;  %v847_v25 = vrot.slane %v2905_v52, 4  ;;  %v1191_v9 = vrot.slane %v1165_v30, 4  ;;  %v1142_v63 = vsel %vm832_vm7, %v1139_v51, %v1141_v56 }
 0x237   : > { %v901_v62 = vsel %vm832_vm7, %v898_v39, %v900_v35  ;;  %v770_v31 = vmax.f32 %v717_v6, %v736_v27  ;;  %1250 = vrot.lane.b32.xlu0 %v1222_v4, %s1920_s23  ;;  %v614_v26 = vpop.permute.xlu2 %613  ;;  %v616_v57 = vpop.permute.xlu0 %615  ;;  %v1090_v35 = vsel %vm779_vm6, %v1087_v16, %v1089_v49  ;;  %v1013_v6 = vmax.f32 %v2723_v60, %v984_v40 }
 0x238   : > { %v926_v53 = vmax.f32 %v2915_v54, %v901_v62  ;;  %v2953_v46 = vmax.f32 %v2861_v36, %v614_v26  ;;  %v594_v43 = vpop.permute.xlu1 %593  ;;  %v652_v23 = vmax.f32 %v2640_v7, %v616_v57  ;;  %v1193_v41 = vsel %vm832_vm7, %v1191_v9, %v1192_v42 }
 0x239   : > { %v641_v4 = vmax.f32 %v2665_v19, %v594_v43  ;;  %v823_v62 = vmax.f32 %v770_v31, %v789_v61  ;;  %v1221_v26 = vmax.f32 %v1165_v30, %v1193_v41  ;;  %v1118_v57 = vmax.f32 %v1066_v58, %v1090_v35 }
 0x23a   : > { %v934_v27 = vmax.f32 %v926_v53, %v2872_v10  ;;  %v691_v49 = vrot.slane %v2953_v46, 1  ;;  %v744_v34 = vrot.slane %v2953_v46, 2  ;;  %v3346_v19 = vrot.slane %v2723_v60, 2 }
 0x23b   : > { %v674_v42 = vrot.slane %v641_v4, 1  ;;  %1248 = vrot.lane.b32.xlu2 %v1221_v26, %s1920_s23  ;;  %v727_v56 = vrot.slane %v641_v4, 2  ;;  %v780_v40 = vrot.slane %v641_v4, 3  ;;  %v833_v9 = vrot.slane %v641_v4, 4 }
 0x23c   : > { %v1036_v7 = vsel %vm726_vm5, %v3346_v19, %v1035_v13  ;;  %943 = vst.msk [vmem:[%s2024_s18 + $0x8] sm:$0xff] %vm941_vm1, %v934_v27  ;;  %v693_v10 = vrot.slane %v652_v23, 1  ;;  %v797_v30 = vrot.slane %v2953_v46, 3  ;;  %v746_v58 = vrot.slane %v652_v23, 2 }
 0x23d   : > { %v676_v61 = vsel %vm673_vm4, %v674_v42, %v675_v59  ;;  %v799_v31 = vrot.slane %v652_v23, 3  ;;  %v2984_v53 = vmax.f32 %v823_v62, %v842_v21  ;;  %v850_v13 = vrot.slane %v2953_v46, 4 }
 0x23e   : > { %v714_v43 = vmax.f32 %v641_v4, %v676_v61  ;;  %v729_v35 = vsel %vm726_vm5, %v727_v56, %v728_v28  ;;  %v782_v41 = vsel %vm779_vm6, %v780_v40, %v781_v11  ;;  %v835_v27 = vsel %vm832_vm7, %v833_v9, %v834_v38 }
 0x23f   : > { %v694_v59 = vsel %vm673_vm4, %v691_v49, %v693_v10  ;;  %v747_v21 = vsel %vm726_vm5, %v744_v34, %v746_v58  ;;  %v620_v4 = vpop.permute.xlu2 %619  ;;  %v1170_v26 = vmax.f32 %v1118_v57, %v1142_v63  ;;  %v1065_v42 = vmax.f32 %v1013_v6, %v1036_v7  ;;  %v622_v10 = vpop.permute.xlu0 %621 }
 0x240   : > { %v767_v62 = vmax.f32 %v714_v43, %v729_v35  ;;  %v722_v28 = vmax.f32 %v2953_v46, %v694_v59  ;;  %v606_v19 = vpop.permute.xlu1 %605  ;;  %v800_v47 = vsel %vm779_vm6, %v797_v30, %v799_v31  ;;  %v852_v11 = vrot.slane %v652_v23, 4 }
 0x241   : > { %v3347_v38 = vrot.slane %v2723_v60, 3  ;;  %v3348_v40 = vrot.slane %v2723_v60, 4  ;;  %v1199_v57 = vrot.slane %v1170_v26, 4  ;;  %v3025_v31 = vmax.f32 %v2918_v55, %v620_v4 }
 0x242   : > { %v820_v63 = vmax.f32 %v767_v62, %v782_v41  ;;  %v775_v6 = vmax.f32 %v722_v28, %v747_v21  ;;  %v647_v12 = vmax.f32 %v2678_v22, %v606_v19  ;;  %v902_v59 = vrot.slane %v2984_v53, 4 }
 0x243   : > { %v1088_v56 = vsel %vm779_vm6, %v3347_v38, %v1087_v16  ;;  %v1138_v9 = vsel %vm832_vm7, %v1136_v48, %v3348_v40  ;;  %v3349_v23 = vmov %v3348_v40  ;;  %v3350_v16 = vmax.f32 %v2835_v2, %v2789_v14 }
 0x244   : > { %v1117_v7 = vmax.f32 %v1065_v42, %v1088_v56  ;;  %v1140_v61 = vsel %vm832_vm7, %v3349_v23, %v1139_v51  ;;  %v873_v48 = vmax.f32 %v820_v63, %v835_v27  ;;  %v828_v43 = vmax.f32 %v775_v6, %v800_v47 }
 0x245   : > { %v1168_v58 = vmax.f32 %v3350_v16, %v1138_v9  ;;  %v1226_v35 = vmax.f32 %v1170_v26, %v1199_v57  ;;  %v853_v36 = vsel %vm832_vm7, %v850_v13, %v852_v11  ;;  %v3033_v21 = vmax.f32 %v2827_v45, %v622_v10 }
 0x246   : > { %v1169_v41 = vmax.f32 %v1117_v7, %v1140_v61  ;;  %v897_v14 = vrot.slane %v873_v48, 4  ;;  %v696_v22 = vrot.slane %v3025_v31, 1  ;;  %v749_v27 = vrot.slane %v3025_v31, 2 }
 0x247   : > { %v1196_v51 = vrot.slane %v1168_v58, 4  ;;  %1258 = vrot.lane.b32.xlu1 %v1226_v35, %s1920_s23  ;;  %v3038_v4 = vmax.f32 %v828_v43, %v853_v36  ;;  %v802_v62 = vrot.slane %v3025_v31, 3  ;;  %v684_v28 = vrot.slane %v647_v12, 1  ;;  %v3046_v38 = vpop.permute.xlu2 %1513 }
 0x248   : > { %v1197_v2 = vrot.slane %v1169_v41, 4  ;;  %v737_v26 = vrot.slane %v647_v12, 2  ;;  %v899_v42 = vsel %vm832_vm7, %v897_v14, %v898_v39  ;;  %v790_v11 = vrot.slane %v647_v12, 3  ;;  %v3048_v56 = vpop.permute.xlu1 %611  ;;  %1701 = vst.msk [vmem:[%s2024_s18 + $0x7c] sm:$0xf0] %vm1550_vm8, %v3046_v38 }
 0x249   : > { %v925_v40 = vmax.f32 %v873_v48, %v899_v42  ;;  %v685_v6 = vsel %vm673_vm4, %v682_v24, %v684_v28  ;;  %v855_v7 = vrot.slane %v3025_v31, 4  ;;  %v3351_v39 = vrot.slane %v2687_v29, 1 }
 0x24a   : > { %v1200_v19 = vsel %vm832_vm7, %v1197_v2, %v1199_v57  ;;  %v1198_v47 = vsel %vm832_vm7, %v1196_v51, %v1197_v2  ;;  %v718_v10 = vmax.f32 %v2856_v33, %v685_v6  ;;  %v843_v23 = vrot.slane %v647_v12, 4 }
 0x24b   : > { %v1225_v9 = vmax.f32 %v1169_v41, %v1200_v19  ;;  %v1224_v63 = vmax.f32 %v1168_v58, %v1198_v47  ;;  %v687_v57 = vsel %vm673_vm4, %v684_v28, %v3351_v39  ;;  %v933_v61 = vmax.f32 %v925_v40, %v2915_v54 }
 0x24c   : > { %v719_v16 = vmax.f32 %v647_v12, %v687_v57  ;;  %v738_v24 = vsel %vm726_vm5, %v735_v20, %v737_v26  ;;  %v698_v58 = vrot.slane %v3033_v21, 1  ;;  %v910_v48 = vrot.slane %v3038_v4, 4 }
 0x24d   : > { %1256 = vrot.lane.b32.xlu0 %v1225_v9, %s1920_s23  ;;  %1254 = vrot.lane.b32.xlu2 %v1224_v63, %s1920_s23  ;;  %v3352_v43 = vrot.slane %v2687_v29, 2  ;;  %v771_v41 = vmax.f32 %v718_v10, %v738_v24  ;;  %v791_v54 = vsel %vm779_vm6, %v788_v37, %v790_v11  ;;  %942 = vst.msk [vmem:[%s2024_s18] sm:$0xff] %vm941_vm1, %v933_v61  ;;  %v3353_v36 = vrot.slane %v2687_v29, 3 }
 0x24e   : > { %v699_v51 = vsel %vm673_vm4, %v696_v22, %v698_v58  ;;  %v751_v14 = vrot.slane %v3033_v21, 2  ;;  %v844_v37 = vsel %vm832_vm7, %v841_v0, %v843_v23  ;;  %v804_v47 = vrot.slane %v3033_v21, 3 }
 0x24f   : > { %v740_v35 = vsel %vm726_vm5, %v737_v26, %v3352_v43  ;;  %v793_v20 = vsel %vm779_vm6, %v790_v11, %v3353_v36  ;;  %v824_v2 = vmax.f32 %v771_v41, %v791_v54  ;;  %v724_v28 = vmax.f32 %v3025_v31, %v699_v51  ;;  %v1520_v24 = vpop.permute.xlu2 %1519 }
 0x250   : > { %v772_v12 = vmax.f32 %v719_v16, %v740_v35  ;;  %v990_v26 = vrot.slane %v2827_v45, 1  ;;  %v752_v19 = vsel %vm726_vm5, %v749_v27, %v751_v14  ;;  %v1042_v11 = vrot.slane %v2827_v45, 2  ;;  %v1516_v16 = vpop.permute.xlu0 %1515  ;;  %v618_v54 = vpop.permute.xlu1 %617  ;;  %1704 = vst.msk [vmem:[%s2024_s18 + $0x8c] sm:$0xf0] %vm1550_vm8, %v1520_v24 }
 0x251   : > { %v3354_v33 = vrot.slane %v2687_v29, 4  ;;  %v877_v40 = vmax.f32 %v824_v2, %v844_v37  ;;  %v777_v9 = vmax.f32 %v724_v28, %v752_v19  ;;  %v3355_v63 = vrot.slane %v2644_v17, 1  ;;  %1702 = vst.msk [vmem:[%s2024_s18 + $0x84] sm:$0xff] %vm941_vm1, %v1516_v16 }
 0x252   : > { %v825_v42 = vmax.f32 %v772_v12, %v793_v20  ;;  %v857_v57 = vrot.slane %v3033_v21, 4  ;;  %v1094_v61 = vrot.slane %v2827_v45, 3  ;;  %v3356_v29 = vrot.slane %v2644_v17, 2 }
 0x253   : > { %v846_v0 = vsel %vm832_vm7, %v843_v23, %v3354_v33  ;;  %v993_v6 = vsel %vm673_vm4, %v990_v26, %v3355_v63  ;;  %v903_v43 = vrot.slane %v877_v40, 4  ;;  %v1146_v35 = vrot.slane %v2827_v45, 4 }
 0x254   : > { %v878_v39 = vmax.f32 %v825_v42, %v846_v0  ;;  %v1017_v10 = vmax.f32 %v2827_v45, %v993_v6  ;;  %v1045_v23 = vsel %vm726_vm5, %v1042_v11, %v3356_v29  ;;  %v988_v41 = vrot.slane %v2918_v55, 1 }
 0x255   : > { %v805_v36 = vsel %vm779_vm6, %v802_v62, %v804_v47  ;;  %v1040_v51 = vrot.slane %v2918_v55, 2  ;;  %v904_v2 = vsel %vm832_vm7, %v902_v59, %v903_v43  ;;  %v3357_v37 = vrot.slane %v2644_v17, 3 }
 0x256   : > { %v905_v12 = vrot.slane %v878_v39, 4  ;;  %v1069_v20 = vmax.f32 %v1017_v10, %v1045_v23  ;;  %v830_v45 = vmax.f32 %v777_v9, %v805_v36  ;;  %v991_v42 = vsel %vm673_vm4, %v988_v41, %v990_v26 }
 0x257   : > { %v1097_v28 = vsel %vm779_vm6, %v1094_v61, %v3357_v37  ;;  %v927_v33 = vmax.f32 %v2984_v53, %v904_v2  ;;  %v1016_v63 = vmax.f32 %v2918_v55, %v991_v42  ;;  %v3358_v10 = vrot.slane %v2644_v17, 4 }
 0x258   : > { %v906_v19 = vsel %vm832_vm7, %v903_v43, %v905_v12  ;;  %v1121_v0 = vmax.f32 %v1069_v20, %v1097_v28  ;;  %v1043_v9 = vsel %vm726_vm5, %v1040_v51, %v1042_v11  ;;  %v1092_v16 = vrot.slane %v2918_v55, 3  ;;  %v624_v42 = vpop.permute.xlu1 %623 }
 0x259   : > { %v928_v6 = vmax.f32 %v877_v40, %v906_v19  ;;  %v1149_v59 = vsel %vm832_vm7, %v1146_v35, %v3358_v10  ;;  %v935_v29 = vmax.f32 %v927_v33, %v877_v40  ;;  %v1068_v23 = vmax.f32 %v1016_v63, %v1043_v9  ;;  %v1526_v63 = vpop.permute.xlu2 %1525 }
 0x25a   : > { %v1173_v26 = vmax.f32 %v1121_v0, %v1149_v59  ;;  %v1144_v43 = vrot.slane %v2918_v55, 4  ;;  %v858_v53 = vsel %vm832_vm7, %v855_v7, %v857_v57  ;;  %v1095_v36 = vsel %vm779_vm6, %v1092_v16, %v1094_v61  ;;  %1707 = vst.msk [vmem:[%s2024_s18 + $0x9c] sm:$0xf0] %vm1550_vm8, %v1526_v63 }
 0x25b   : > { %v936_v12 = vmax.f32 %v928_v6, %v878_v39  ;;  %v987_v20 = vrot.slane %v2772_v15, 1  ;;  %944 = vst.msk [vmem:[%s2024_s18 + $0x10] sm:$0xff] %vm941_vm1, %v935_v29  ;;  %v3142_v11 = vmax.f32 %v830_v45, %v858_v53  ;;  %v1120_v2 = vmax.f32 %v1068_v23, %v1095_v36  ;;  %v1522_v39 = vpop.permute.xlu0 %1521 }
 0x25c   : > { %v1204_v40 = vrot.slane %v1173_v26, 4  ;;  %v1039_v55 = vrot.slane %v2772_v15, 2  ;;  %v1147_v37 = vsel %vm832_vm7, %v1144_v43, %v1146_v35  ;;  %v1091_v61 = vrot.slane %v2772_v15, 3  ;;  %1705 = vst.msk [vmem:[%s2024_s18 + $0x94] sm:$0xff] %vm941_vm1, %v1522_v39 }
 0x25d   : > { %945 = vst.msk [vmem:[%s2024_s18 + $0x18] sm:$0xff] %vm941_vm1, %v936_v12  ;;  %v989_v28 = vsel %vm673_vm4, %v987_v20, %v988_v41  ;;  %v1172_v45 = vmax.f32 %v1120_v2, %v1147_v37  ;;  %v1143_v0 = vrot.slane %v2772_v15, 4  ;;  %v650_v6 = vmax.f32 %v2723_v60, %v3048_v56 }
 0x25e   : > { %v1229_v19 = vmax.f32 %v1173_v26, %v1204_v40  ;;  %v1015_v33 = vmax.f32 %v2772_v15, %v989_v28  ;;  %v1041_v35 = vsel %vm726_vm5, %v1039_v55, %v1040_v51  ;;  %v1093_v41 = vsel %vm779_vm6, %v1091_v61, %v1092_v16 }
 0x25f   : > { %v653_v10 = vmax.f32 %v2772_v15, %v618_v54  ;;  %v1202_v59 = vrot.slane %v1172_v45, 4  ;;  %v1145_v29 = vsel %vm832_vm7, %v1143_v0, %v1144_v43  ;;  %v3167_v38 = vmax.f32 %v2644_v17, %v624_v42 }
 0x260   : > { %1264 = vrot.lane.b32.xlu1 %v1229_v19, %s1920_s23  ;;  %v1067_v9 = vmax.f32 %v1015_v33, %v1041_v35  ;;  %v689_v51 = vrot.slane %v650_v6, 1  ;;  %v742_v16 = vrot.slane %v650_v6, 2  ;;  %v795_v26 = vrot.slane %v650_v6, 3  ;;  %v1518_v39 = vpop.permute.xlu1 %1517 }
 0x261   : > { %v848_v23 = vrot.slane %v650_v6, 4  ;;  %v1205_v60 = vsel %vm832_vm7, %v1202_v59, %v1204_v40  ;;  %v695_v56 = vrot.slane %v653_v10, 1  ;;  %v748_v43 = vrot.slane %v653_v10, 2  ;;  %1703 = vst.msk [vmem:[%s2024_s18 + $0x8c] sm:$0xf] %vm1553_vm9, %v1518_v39 }
 0x262   : > { %v1119_v15 = vmax.f32 %v1067_v9, %v1093_v41  ;;  %v1228_v24 = vmax.f32 %v1172_v45, %v1205_v60  ;;  %v690_v54 = vsel %vm673_vm4, %v688_v18, %v689_v51  ;;  %v692_v17 = vsel %vm673_vm4, %v689_v51, %v691_v49 }
 0x263   : > { %v720_v53 = vmax.f32 %v2905_v52, %v690_v54  ;;  %v721_v36 = vmax.f32 %v650_v6, %v692_v17  ;;  %v743_v20 = vsel %vm726_vm5, %v741_v5, %v742_v16  ;;  %v1528_v40 = vpop.permute.xlu0 %1527  ;;  %v745_v18 = vsel %vm726_vm5, %v742_v16, %v744_v34 }
 0x264   : > { %v1171_v12 = vmax.f32 %v1119_v15, %v1145_v29  ;;  %1262 = vrot.lane.b32.xlu0 %v1228_v24, %s1920_s23  ;;  %v3359_v49 = vrot.slane %v2905_v52, 3  ;;  %v798_v55 = vsel %vm779_vm6, %v795_v26, %v797_v30  ;;  %v849_v5 = vsel %vm832_vm7, %v847_v25, %v848_v23  ;;  %1708 = vst.msk [vmem:[%s2024_s18 + $0xa4] sm:$0xff] %vm941_vm1, %v1528_v40 }
 0x265   : > { %v773_v28 = vmax.f32 %v720_v53, %v743_v20  ;;  %v774_v61 = vmax.f32 %v721_v36, %v745_v18  ;;  %v697_v34 = vsel %vm673_vm4, %v695_v56, %v696_v22  ;;  %v750_v19 = vsel %vm726_vm5, %v748_v43, %v749_v27 }
 0x266   : > { %v796_v2 = vsel %vm779_vm6, %v3359_v49, %v795_v26  ;;  %v1201_v37 = vrot.slane %v1171_v12, 4  ;;  %v723_v42 = vmax.f32 %v653_v10, %v697_v34  ;;  %v801_v30 = vrot.slane %v653_v10, 3 }
 0x267   : > { %v854_v45 = vrot.slane %v653_v10, 4  ;;  %v826_v25 = vmax.f32 %v773_v28, %v796_v2  ;;  %v827_v33 = vmax.f32 %v774_v61, %v798_v55  ;;  %v700_v22 = vrot.slane %v3167_v38, 1 }
 0x268   : > { %v1203_v52 = vsel %vm832_vm7, %v1201_v37, %v1202_v59  ;;  %1535 = vrot.lane.b32.xlu1 %v2647_v50, %s1922_s25  ;;  %v851_v63 = vsel %vm832_vm7, %v848_v23, %v850_v13  ;;  %v776_v35 = vmax.f32 %v723_v42, %v750_v19  ;;  %v803_v27 = vsel %vm779_vm6, %v801_v30, %v802_v62  ;;  %v1524_v60 = vpop.permute.xlu1 %1523 }
 0x269   : > { %v1227_v0 = vmax.f32 %v1171_v12, %v1203_v52  ;;  %v879_v41 = vmax.f32 %v826_v25, %v849_v5  ;;  %v880_v6 = vmax.f32 %v827_v33, %v851_v63  ;;  %v701_v10 = vsel %vm673_vm4, %v698_v58, %v700_v22  ;;  %1706 = vst.msk [vmem:[%s2024_s18 + $0x9c] sm:$0xf] %vm1553_vm9, %v1524_v60 }
 0x26a   : > { %v753_v50 = vrot.slane %v3167_v38, 2  ;;  %v829_v59 = vmax.f32 %v776_v35, %v803_v27  ;;  %v856_v46 = vsel %vm832_vm7, %v854_v45, %v855_v7  ;;  %v725_v13 = vmax.f32 %v3033_v21, %v701_v10 }
 0x26b   : > { %1260 = vrot.lane.b32.xlu2 %v1227_v0, %s1920_s23  ;;  %v806_v62 = vrot.slane %v3167_v38, 3  ;;  %v907_v9 = vrot.slane %v879_v41, 4  ;;  %v908_v29 = vrot.slane %v880_v6, 4  ;;  %v859_v51 = vrot.slane %v3167_v38, 4 }
 0x26c   : > { %v754_v58 = vsel %vm726_vm5, %v751_v14, %v753_v50  ;;  %1533 = vrot.lane.b32.xlu0 %v2658_v8, %s1922_s25  ;;  %v3360_v31 = vrot.slane %v2385_v32, 4  ;;  %v3361_v7 = vrot.slane %v2341_v44, 4  ;;  %v882_v26 = vmax.f32 %v829_v59, %v856_v46 }
 0x26d   : > { %v778_v23 = vmax.f32 %v725_v13, %v754_v58  ;;  %v913_v15 = vrot.slane %v3142_v11, 4  ;;  %v909_v56 = vsel %vm832_vm7, %v907_v9, %v908_v29  ;;  %v911_v14 = vsel %vm832_vm7, %v908_v29, %v910_v48 }
 0x26e   : > { %v1472_v16 = vsel %vm832_vm7, %v3361_v7, %v3360_v31  ;;  %v807_v32 = vsel %vm779_vm6, %v804_v47, %v806_v62  ;;  %v929_v44 = vmax.f32 %v879_v41, %v909_v56  ;;  %v930_v8 = vmax.f32 %v880_v6, %v911_v14 }
 0x26f   : > { %v912_v38 = vrot.slane %v882_v26, 4  ;;  %v831_v24 = vmax.f32 %v778_v23, %v807_v32  ;;  %v3362_v54 = vmax.f32 %v2637_v1, %v2653_v3  ;;  %v860_v48 = vsel %vm832_vm7, %v857_v57, %v859_v51 }
 0x270   : > { %v937_v43 = vmax.f32 %v929_v44, %v880_v6  ;;  %v938_v47 = vmax.f32 %v930_v8, %v3038_v4  ;;  %v1530_v4 = vpop.permute.xlu1 %1529 }
 0x271   : > { %v1498_v17 = vmax.f32 %v3362_v54, %v1472_v16  ;;  %v914_v12 = vsel %vm832_vm7, %v912_v38, %v913_v15  ;;  %v884_v53 = vmax.f32 %v831_v24, %v860_v48  ;;  %1709 = vst.msk [vmem:[%s2024_s18 + $0xac] sm:$0xf] %vm1553_vm9, %v1530_v4 }
 0x272   : > { %v931_v36 = vmax.f32 %v882_v26, %v914_v12  ;;  %946 = vst.msk [vmem:[%s2024_s18 + $0x20] sm:$0xff] %vm941_vm1, %v937_v43 }
 0x273   : > { %1531 = vrot.lane.b32.xlu2 %v1498_v17, %s1922_s25  ;;  %v915_v1 = vrot.slane %v884_v53, 4  ;;  %947 = vst.msk [vmem:[%s2024_s18 + $0x28] sm:$0xff] %vm941_vm1, %v938_v47 }
 0x274   : > { %v939_v3 = vmax.f32 %v931_v36, %v3142_v11 }
 0x275   : > { %v916_v21 = vsel %vm832_vm7, %v913_v15, %v915_v1 }
 0x276   : > { %948 = vst.msk [vmem:[%s2024_s18 + $0x30] sm:$0xff] %vm941_vm1, %v939_v3  ;;  %v932_v57 = vmax.f32 %v3142_v11, %v916_v21 }
 0x278   : > { %v940_v20 = vmax.f32 %v932_v57, %v884_v53 }
 0x27a   : > { %949 = vst.msk [vmem:[%s2024_s18 + $0x38] sm:$0xff] %vm941_vm1, %v940_v20 }
 0x289   : > { %v1243_v40 = vpop.permute.xlu2 %1242 }
 0x28a   : > { %1689 = vst.msk [vmem:[%s2024_s18 + $0x3e] sm:$0xfc] %vm1279_vm10, %v1243_v40 }
 0x28b   : > { %v1247_v18 = vpop.permute.xlu1 %1246 }
 0x28c   : > { %1691 = vst.msk [vmem:[%s2024_s18 + $0x4e] sm:$0x3] %vm1282_vm11, %v1247_v18 }
 0x293   : > { %v1253_v49 = vpop.permute.xlu1 %1252 }
 0x294   : > { %1694 = vst.msk [vmem:[%s2024_s18 + $0x5e] sm:$0x3] %vm1282_vm11, %v1253_v49 }
 0x295   : > { %v1249_v11 = vpop.permute.xlu2 %1248 }
 0x296   : > { %1692 = vst.msk [vmem:[%s2024_s18 + $0x4e] sm:$0xfc] %vm1279_vm10, %v1249_v11 }
 0x2a1   : > { %v1245_v2 = vpop.permute.xlu0 %1244 }
 0x2a2   : > { %1690 = vst.msk [vmem:[%s2024_s18 + $0x46] sm:$0xff] %vm941_vm1, %v1245_v2 }
 0x2a7   : > { %v1255_v55 = vpop.permute.xlu2 %1254 }
 0x2a8   : > { %1695 = vst.msk [vmem:[%s2024_s18 + $0x5e] sm:$0xfc] %vm1279_vm10, %v1255_v55 }
 0x2a9   : > { %v1251_v5 = vpop.permute.xlu0 %1250 }
 0x2aa   : > { %1693 = vst.msk [vmem:[%s2024_s18 + $0x56] sm:$0xff] %vm941_vm1, %v1251_v5 }
 0x2b9   : > { %v1259_v39 = vpop.permute.xlu1 %1258 }
 0x2ba   : > { %1697 = vst.msk [vmem:[%s2024_s18 + $0x6e] sm:$0x3] %vm1282_vm11, %v1259_v39 }
 0x2bf   : > { %v1257_v37 = vpop.permute.xlu0 %1256 }
 0x2c0   : > { %1696 = vst.msk [vmem:[%s2024_s18 + $0x66] sm:$0xff] %vm941_vm1, %v1257_v37 }
 0x2c5   : > { %v1261_v28 = vpop.permute.xlu2 %1260 }
 0x2c6   : > { %1698 = vst.msk [vmem:[%s2024_s18 + $0x6e] sm:$0xfc] %vm1279_vm10, %v1261_v28 }
 0x2cd   : > { %v1532_v61 = vpop.permute.xlu2 %1531 }
 0x2ce   : > { %1710 = vst.msk [vmem:[%s2024_s18 + $0xac] sm:$0xf0] %vm1550_vm8, %v1532_v61 }
 0x2d2   : > { %v1265_v34 = vpop.permute.xlu1 %1264 }
 0x2d3   : > { %1700 = vst.msk [vmem:[%s2024_s18 + $0x7e] sm:$0x3] %vm1282_vm11, %v1265_v34 }
 0x2d6   : > { %v1263_v42 = vpop.permute.xlu0 %1262 }
 0x2d7   : > { %1699 = vst.msk [vmem:[%s2024_s18 + $0x76] sm:$0xff] %vm941_vm1, %v1263_v42 }
 0x2da   : > { %v1536_v19 = vpop.permute.xlu1 %1535 }
 0x2db   : > { %1712 = vst.msk [vmem:[%s2024_s18 + $0xbc] sm:$0xf] %vm1553_vm9, %v1536_v19 }
 0x2de   : > { %v1534_v30 = vpop.permute.xlu0 %1533 }
 0x2df   : > { %1711 = vst.msk [vmem:[%s2024_s18 + $0xb4] sm:$0xff] %vm941_vm1, %v1534_v30 }
 0x2e0   : > { %1858 = shalt.err (!%p1855_p13)
}
 0x2e1   : > { %s1924_s5 = smov 128   ;;  %s1925_s18 = smov 8  }
 0x2e2   : > { %1730 = dma.vmem_to_hbm [thread:$0]  (%p1987_p9), %s1590_s2, 4096, %s1592_s3, %s1574_s4, %s1924_s5, %s1924_s5, %s1925_s18  }
 0x2e3 PF: > { %s1606_s23 = sand.u32 1, %s1893_s6   ;;  %p1737_p0 = pnand %p1682_p12, %p1994_p11 }
 0x2e4   : > { %s1607_s24 = scalar_lea.sflag [#allocation5], %s1606_s23 }
 0x2e5   : > { %p1738_p1 = pneg %p1737_p0 }
 0x2e7   : > { %1888 = dma.done.wait (%p1738_p1), %s1607_s24, 4096  }
 0x2e8   : > { %1890 = vsyncadd (%p1738_p1), %s1607_s24, 4294963200  ;;  %s17_s11 = sadd.s32 1, %s1913_s11   ;;  %s3363_s6 = smov %s1897_s7 }
 0x2e9   : > { %p14_p2 = scmp.ge.s32.totalorder %s17_s11, 4   ;;  %s3364_s7 = smov %s1901_s8 }
 0x2ea   : > { %s3365_s8 = smov %s1992_s20  ;;  %s3366_s9 = smov %s1909_s10 }
 0x2eb   : > { %s3367_s10 = smov %s3369_s14  ;;  %16 = sbr.rel (!%p14_p2) target bundleno = 6 (0x6), region = 72 }
 0x2f0   :  { %1613 = vsyncpa [#allocation4], 1 }
 0x2f1   :  { %1615 = vsyncpa [#allocation4 + $0x1], 1 }
 0x2f2   :  { %1616 = vsyncpa [#allocation5], 1 }
 0x2f3   :  { %1618 = vsyncpa [#allocation5 + $0x1], 1 }

</bundles_post_ra>
